<compile_context>
chip_gen: v7x
topology: tpu7x:2x2x1
jax: 0.10.0
libtpu: 0.0.40
codegen_flags: <defaults>
</compile_context>

<pallas_src>
import functools

import jax
import jax.numpy as jnp
from jax.experimental import pallas as pl
from jax.experimental.pallas import tpu as pltpu


# ---------------------------------------------------------------------------
# In-kernel helpers
# ---------------------------------------------------------------------------
def _layernorm(x, a, b):
    # Matches torch: mean over last dim, unbiased std (/(D-1)), divide by (std + 1e-6).
    mean = jnp.mean(x, axis=-1, keepdims=True)
    var = jnp.sum((x - mean) ** 2, axis=-1, keepdims=True) / (x.shape[-1] - 1)
    inv = pl.reciprocal(jnp.sqrt(var) + 1e-6, approx=True)
    return a * (x - mean) * inv + b


# ---------------------------------------------------------------------------
# Whole encoder stack (N layers + final LN) in a single kernel.
# grid = (B, N_layers); residual stream is carried in VMEM scratch across layers.
# ---------------------------------------------------------------------------
def encoder_stack_kernel(x_ref, mask_ref,
                         ln1a_ref, ln1b_ref,
                         wqkv_ref, bqkv_ref,
                         woh_ref, bo_ref,
                         ln2a_ref, ln2b_ref,
                         w1_ref, b1_ref, w2_ref, b2_ref,
                         fa_ref, fb_ref,
                         out_ref,
                         x_scratch, *, num_heads):
    l = pl.program_id(1)
    n_layers = pl.num_programs(1)

    @pl.when(l == 0)
    def _():
        x_scratch[...] = x_ref[0].astype(jnp.float32)

    x = x_scratch[...]                      # (S, D) f32 residual stream
    mask = mask_ref[0]                      # (S, S)
    S, D = x.shape
    H = num_heads
    dk = D // H
    scale = float(dk) ** -0.5

    # ---- sublayer 0: pre-LN multi-head self-attention -----------------------
    xn = _layernorm(x, ln1a_ref[0], ln1b_ref[0])
    # fused QKV projection: one (S,D) x (D,3D) bf16 matmul, f32 accumulation.
    qkv = jnp.dot(xn.astype(jnp.bfloat16), wqkv_ref[0],
                  preferred_element_type=jnp.float32) + bqkv_ref[0]   # (S, 3D) f32

    def heads(mat):  # (S, D) -> (H, S, dk) bf16, head-major (no lane-dim concat)
        return jnp.stack(
            [mat[:, h * dk:(h + 1) * dk] for h in range(H)], axis=0
        ).astype(jnp.bfloat16)

    # fold 1/sqrt(dk) into Q (O(S*D) muls instead of O(H*S*S) on the scores)
    qh = heads(qkv[:, 0 * D:1 * D] * scale)
    kh = heads(qkv[:, 1 * D:2 * D])
    vh = heads(qkv[:, 2 * D:3 * D])

    # batched-over-heads score / context matmuls (MXU, bf16 in, f32 acc)
    s = jnp.einsum('hqd,hkd->hqk', qh, kh,
                   preferred_element_type=jnp.float32)                # (H, S, S)
    s = jnp.where(mask[None, :, :] == 0, -1e9, s)
    s = s - jnp.max(s, axis=-1, keepdims=True)
    p = jnp.exp(s)
    p = p * pl.reciprocal(jnp.sum(p, axis=-1, keepdims=True), approx=True)

    ctx = jnp.einsum('hqk,hkd->hqd', p.astype(jnp.bfloat16), vh,
                     preferred_element_type=jnp.float32)              # (H, S, dk)
    # output projection with per-head weights (H, dk, D); sum over heads is
    # mathematically identical to concat(heads) @ Wo.
    attn = jnp.einsum('hqd,hde->hqe', ctx.astype(jnp.bfloat16), woh_ref[0],
                      preferred_element_type=jnp.float32)             # (H, S, D)
    attn = jnp.sum(attn, axis=0) + bo_ref[0]
    x1 = x + attn                                  # dropout p=0.0 -> identity

    # ---- sublayer 1: pre-LN position-wise FFN --------------------------------
    xn2 = _layernorm(x1, ln2a_ref[0], ln2b_ref[0])
    h1 = jnp.dot(xn2.astype(jnp.bfloat16), w1_ref[0],
                 preferred_element_type=jnp.float32) + b1_ref[0]
    h1 = jnp.maximum(h1, 0.0)
    ff = jnp.dot(h1.astype(jnp.bfloat16), w2_ref[0],
                 preferred_element_type=jnp.float32) + b2_ref[0]
    x_new = x1 + ff

    x_scratch[...] = x_new

    @pl.when(l == n_layers - 1)
    def _():
        out_ref[0] = _layernorm(x_new, fa_ref[...], fb_ref[...]).astype(out_ref.dtype)


# ---------------------------------------------------------------------------
# Wrapper: pack per-layer params into stacked (N_layers, ...) arrays (bf16 weights)
# ---------------------------------------------------------------------------
_PACKED_ORDER = ("ln1a", "ln1b", "wqkv", "bqkv", "woh", "bo",
                 "ln2a", "ln2b", "w1", "b1", "w2", "b2")


def pack_encoder_params(layer_params, num_heads):
    D = layer_params[0]["wq"].shape[0]
    dk = D // num_heads

    def stack(name):
        return jnp.stack([p[name] for p in layer_params], axis=0)

    wqkv = jnp.stack([jnp.concatenate([p["wq"], p["wk"], p["wv"]], axis=1)
                      for p in layer_params], axis=0).astype(jnp.bfloat16)   # (N,D,3D)
    bqkv = jnp.stack([jnp.concatenate([p["bq"], p["bk"], p["bv"]], axis=1)
                      for p in layer_params], axis=0)                        # (N,1,3D)
    woh = jnp.stack([p["wo"].reshape(num_heads, dk, D) for p in layer_params],
                    axis=0).astype(jnp.bfloat16)                             # (N,H,dk,D)
    return {
        "ln1a": stack("ln1a"), "ln1b": stack("ln1b"),
        "wqkv": wqkv, "bqkv": bqkv,
        "woh": woh, "bo": stack("bo"),
        "ln2a": stack("ln2a"), "ln2b": stack("ln2b"),
        "w1": stack("w1").astype(jnp.bfloat16), "b1": stack("b1"),
        "w2": stack("w2").astype(jnp.bfloat16), "b2": stack("b2"),
    }


def encoder_forward(x, mask, layer_params, final_ln, *, num_heads):
    B, S, D = x.shape
    n_layers = len(layer_params)
    packed = pack_encoder_params(layer_params, num_heads)
    weights = [packed[k] for k in _PACKED_ORDER]

    def layer_spec(arr):
        # Per-layer block (selected by grid axis 1); last two dims are full-extent.
        nd = arr.ndim
        return pl.BlockSpec((1,) + arr.shape[1:],
                            lambda b, l, nd=nd: (l,) + (0,) * (nd - 1))

    in_specs = [pl.BlockSpec((1, S, D), lambda b, l: (b, 0, 0)),   # x
                pl.BlockSpec((1, S, S), lambda b, l: (b, 0, 0))]   # mask
    in_specs += [layer_spec(w) for w in weights]
    in_specs += [pl.BlockSpec(final_ln["a"].shape, lambda b, l: (0, 0)),
                 pl.BlockSpec(final_ln["b"].shape, lambda b, l: (0, 0))]

    return pl.pallas_call(
        functools.partial(encoder_stack_kernel, num_heads=num_heads),
        out_shape=jax.ShapeDtypeStruct((B, S, D), x.dtype),
        grid_spec=pltpu.PrefetchScalarGridSpec(
            num_scalar_prefetch=0,
            grid=(B, n_layers),
            in_specs=in_specs,
            out_specs=pl.BlockSpec((1, S, D), lambda b, l: (b, 0, 0)),
            scratch_shapes=[pltpu.VMEM((S, D), jnp.float32)],
        ),
        compiler_params=pltpu.CompilerParams(
            dimension_semantics=("parallel", "arbitrary")),
    )(x, mask, *weights, final_ln["a"], final_ln["b"])


# ---------------------------------------------------------------------------
# Pure-JAX f32 reference (mirrors the PyTorch forward) for a sanity check
# ---------------------------------------------------------------------------
def _ref_layernorm(x, a, b):
    mean = jnp.mean(x, axis=-1, keepdims=True)
    var = jnp.sum((x - mean) ** 2, axis=-1, keepdims=True) / (x.shape[-1] - 1)
    return a * (x - mean) / (jnp.sqrt(var) + 1e-6) + b


def _ref_layer(x, mask, p, num_heads):
    B, S, D = x.shape
    dk = D // num_heads
    xn = _ref_layernorm(x, p["ln1a"], p["ln1b"])
    q = xn @ p["wq"] + p["bq"]
    k = xn @ p["wk"] + p["bk"]
    v = xn @ p["wv"] + p["bv"]
    q = q.reshape(B, S, num_heads, dk).transpose(0, 2, 1, 3)
    k = k.reshape(B, S, num_heads, dk).transpose(0, 2, 1, 3)
    v = v.reshape(B, S, num_heads, dk).transpose(0, 2, 1, 3)
    s = jnp.einsum("bhqd,bhkd->bhqk", q, k) / jnp.sqrt(jnp.float32(dk))
    s = jnp.where(mask[:, None, :, :] == 0, -1e9, s)
    pw = jax.nn.softmax(s, axis=-1)
    ctx = jnp.einsum("bhqk,bhkd->bhqd", pw, v).transpose(0, 2, 1, 3).reshape(B, S, D)
    x1 = x + (ctx @ p["wo"] + p["bo"])
    xn2 = _ref_layernorm(x1, p["ln2a"], p["ln2b"])
    ff = jnp.maximum(xn2 @ p["w1"] + p["b1"], 0.0) @ p["w2"] + p["b2"]
    return x1 + ff


def _ref_encoder(x, mask, layer_params, final_ln, num_heads):
    for p in layer_params:
        x = _ref_layer(x, mask, p, num_heads)
    return _ref_layernorm(x, final_ln["a"], final_ln["b"])


# ---------------------------------------------------------------------------
# Deterministic parameter construction
# ---------------------------------------------------------------------------
def make_layer_params(key, D, Dff):
    ks = jax.random.split(key, 6)
    scale = 0.05
    return {
        "ln1a": jnp.ones((1, D), jnp.float32),
        "ln1b": jnp.zeros((1, D), jnp.float32),
        "wq": scale * jax.random.normal(ks[0], (D, D), jnp.float32),
        "bq": jnp.zeros((1, D), jnp.float32),
        "wk": scale * jax.random.normal(ks[1], (D, D), jnp.float32),
        "bk": jnp.zeros((1, D), jnp.float32),
        "wv": scale * jax.random.normal(ks[2], (D, D), jnp.float32),
        "bv": jnp.zeros((1, D), jnp.float32),
        "wo": scale * jax.random.normal(ks[3], (D, D), jnp.float32),
        "bo": jnp.zeros((1, D), jnp.float32),
        "ln2a": jnp.ones((1, D), jnp.float32),
        "ln2b": jnp.zeros((1, D), jnp.float32),
        "w1": scale * jax.random.normal(ks[4], (D, Dff), jnp.float32),
        "b1": jnp.zeros((1, Dff), jnp.float32),
        "w2": scale * jax.random.normal(ks[5], (Dff, D), jnp.float32),
        "b2": jnp.zeros((1, D), jnp.float32),
    }


if __name__ == "__main__":
    B, S, D, Dff = 2, 8, 32, 64
    NUM_HEADS = 4
    N_LAYERS = 2

    root = jax.random.PRNGKey(0)
    kx, *kl = jax.random.split(root, 1 + N_LAYERS)

    x = jax.random.normal(kx, (B, S, D), jnp.float32)
    # mask: all positions attendable except the last two key positions.
    mask = jnp.ones((B, S, S), jnp.float32)
    mask = mask.at[:, :, -2:].set(0.0)

    layer_params = [make_layer_params(k, D, Dff) for k in kl]
    final_ln = {"a": jnp.ones((1, D), jnp.float32),
                "b": jnp.zeros((1, D), jnp.float32)}

    out = encoder_forward(x, mask, layer_params, final_ln, num_heads=NUM_HEADS)
    out = jax.block_until_ready(out)

    ref = _ref_encoder(x, mask, layer_params, final_ln, NUM_HEADS)
    assert out.shape == (B, S, D)
    # bf16 matmul operands + approx reciprocals loosen the tolerance vs the f32 ref.
    err = float(jnp.max(jnp.abs(out - ref)))
    assert err < 5e-2, f"Pallas output mismatch vs JAX reference (max abs err {err})"

    print("KERNEL_OK")
</pallas_src>

<mosaic_0001>
module attributes {stable_mosaic.version = 11 : i64} {
  func.func @encoder_stack_kernel(%arg0: i32, %arg1: i32, %arg2: memref<1x8x32xf32, #tpu.memory_space<vmem>>, %arg3: memref<1x8x8xf32, #tpu.memory_space<vmem>>, %arg4: memref<1x1x32xf32, #tpu.memory_space<vmem>>, %arg5: memref<1x1x32xf32, #tpu.memory_space<vmem>>, %arg6: memref<1x32x96xbf16, #tpu.memory_space<vmem>>, %arg7: memref<1x1x96xf32, #tpu.memory_space<vmem>>, %arg8: memref<1x4x8x32xbf16, #tpu.memory_space<vmem>>, %arg9: memref<1x1x32xf32, #tpu.memory_space<vmem>>, %arg10: memref<1x1x32xf32, #tpu.memory_space<vmem>>, %arg11: memref<1x1x32xf32, #tpu.memory_space<vmem>>, %arg12: memref<1x32x64xbf16, #tpu.memory_space<vmem>>, %arg13: memref<1x1x64xf32, #tpu.memory_space<vmem>>, %arg14: memref<1x64x32xbf16, #tpu.memory_space<vmem>>, %arg15: memref<1x1x32xf32, #tpu.memory_space<vmem>>, %arg16: memref<1x32xf32, #tpu.memory_space<vmem>>, %arg17: memref<1x32xf32, #tpu.memory_space<vmem>>, %arg18: memref<1x8x32xf32, #tpu.memory_space<vmem>>, %arg19: memref<8x32xf32, #tpu.memory_space<vmem>>) attributes {dimension_semantics = [#tpu.dimension_semantics<parallel>, #tpu.dimension_semantics<arbitrary>], iteration_bounds = array<i64: 2, 2>, scalar_prefetch = 0 : i64, scratch_operands = 1 : i64, tpu.core_type = #tpu.core_type<tc>, window_params = [{transform_indices = @transform_0, window_bounds = array<i64: 1, 8, 32>}, {transform_indices = @transform_1, window_bounds = array<i64: 1, 8, 8>}, {transform_indices = @transform_2, window_bounds = array<i64: 1, 1, 32>}, {transform_indices = @transform_3, window_bounds = array<i64: 1, 1, 32>}, {transform_indices = @transform_4, window_bounds = array<i64: 1, 32, 96>}, {transform_indices = @transform_5, window_bounds = array<i64: 1, 1, 96>}, {transform_indices = @transform_6, window_bounds = array<i64: 1, 4, 8, 32>}, {transform_indices = @transform_7, window_bounds = array<i64: 1, 1, 32>}, {transform_indices = @transform_8, window_bounds = array<i64: 1, 1, 32>}, {transform_indices = @transform_9, window_bounds = array<i64: 1, 1, 32>}, {transform_indices = @transform_10, window_bounds = array<i64: 1, 32, 64>}, {transform_indices = @transform_11, window_bounds = array<i64: 1, 1, 64>}, {transform_indices = @transform_12, window_bounds = array<i64: 1, 64, 32>}, {transform_indices = @transform_13, window_bounds = array<i64: 1, 1, 32>}, {pipeline_mode = #tpu.pipeline_mode<synchronous>, transform_indices = @transform_14, window_bounds = array<i64: 1, 32>}, {pipeline_mode = #tpu.pipeline_mode<synchronous>, transform_indices = @transform_15, window_bounds = array<i64: 1, 32>}, {transform_indices = @transform_16, window_bounds = array<i64: 1, 8, 32>}]} {
    %c0_i32 = arith.constant 0 : i32
    %0 = arith.cmpi eq, %arg1, %c0_i32 : i32
    %1 = arith.extui %0 : i1 to i32
    %c0_i32_0 = arith.constant 0 : i32
    %2 = arith.cmpi ne, %1, %c0_i32_0 : i32
    scf.if %2 {
      %c0_67 = arith.constant 0 : index
      %c0_68 = arith.constant 0 : index
      %c0_69 = arith.constant 0 : index
      %156 = vector.load %arg2[%c0_67, %c0_68, %c0_69] : memref<1x8x32xf32, #tpu.memory_space<vmem>>, vector<1x8x32xf32>
      %157 = vector.shape_cast %156 : vector<1x8x32xf32> to vector<8x32xf32>
      %c0_70 = arith.constant 0 : index
      %c0_71 = arith.constant 0 : index
      %158 = vector.load %arg19[%c0_70, %c0_71] : memref<8x32xf32, #tpu.memory_space<vmem>>, vector<8x32xf32>
      tpu.vector_store %arg19[%c0_70, %c0_71], %157 {strides = array<i32>} : memref<8x32xf32, #tpu.memory_space<vmem>>, vector<8x32xf32>,
    } else {
    }
    %c0 = arith.constant 0 : index
    %c0_1 = arith.constant 0 : index
    %3 = vector.load %arg19[%c0, %c0_1] : memref<8x32xf32, #tpu.memory_space<vmem>>, vector<8x32xf32>
    %c0_2 = arith.constant 0 : index
    %c0_3 = arith.constant 0 : index
    %c0_4 = arith.constant 0 : index
    %4 = vector.load %arg3[%c0_2, %c0_3, %c0_4] : memref<1x8x8xf32, #tpu.memory_space<vmem>>, vector<1x8x8xf32>
    %5 = vector.shape_cast %4 : vector<1x8x8xf32> to vector<8x8xf32>
    %c0_5 = arith.constant 0 : index
    %c0_6 = arith.constant 0 : index
    %c0_7 = arith.constant 0 : index
    %6 = vector.load %arg4[%c0_5, %c0_6, %c0_7] : memref<1x1x32xf32, #tpu.memory_space<vmem>>, vector<1x1x32xf32>
    %7 = vector.shape_cast %6 : vector<1x1x32xf32> to vector<1x32xf32>
    %c0_8 = arith.constant 0 : index
    %c0_9 = arith.constant 0 : index
    %c0_10 = arith.constant 0 : index
    %8 = vector.load %arg5[%c0_8, %c0_9, %c0_10] : memref<1x1x32xf32, #tpu.memory_space<vmem>>, vector<1x1x32xf32>
    %9 = vector.shape_cast %8 : vector<1x1x32xf32> to vector<1x32xf32>
    %cst = arith.constant dense<0.000000e+00> : vector<8xf32>
    %10 = vector.multi_reduction <add>, %3, %cst [1] : vector<8x32xf32> to vector<8xf32>
    %11 = vector.shape_cast %10 : vector<8xf32> to vector<8x1xf32>
    %cst_11 = arith.constant 3.200000e+01 : f32
    %12 = vector.broadcast %cst_11 : f32 to vector<8x1xf32>
    %13 = arith.divf %11, %12 : vector<8x1xf32>
    %14 = vector.broadcast %13 : vector<8x1xf32> to vector<8x32xf32>
    %15 = arith.subf %3, %14 : vector<8x32xf32>
    %16 = arith.mulf %15, %15 : vector<8x32xf32>
    %cst_12 = arith.constant dense<0.000000e+00> : vector<8xf32>
    %17 = vector.multi_reduction <add>, %16, %cst_12 [1] : vector<8x32xf32> to vector<8xf32>
    %18 = vector.shape_cast %17 : vector<8xf32> to vector<8x1xf32>
    %cst_13 = arith.constant 3.100000e+01 : f32
    %19 = vector.broadcast %cst_13 : f32 to vector<8x1xf32>
    %20 = arith.divf %18, %19 : vector<8x1xf32>
    %21 = math.sqrt %20 : vector<8x1xf32>
    %cst_14 = arith.constant 9.99999997E-7 : f32
    %22 = vector.broadcast %cst_14 : f32 to vector<8x1xf32>
    %23 = arith.addf %21, %22 : vector<8x1xf32>
    %24 = tpu.reciprocal %23 {approx = true} : vector<8x1xf32> -> vector<8x1xf32>
    %25 = vector.broadcast %13 : vector<8x1xf32> to vector<8x32xf32>
    %26 = arith.subf %3, %25 : vector<8x32xf32>
    %27 = vector.broadcast %7 : vector<1x32xf32> to vector<8x32xf32>
    %28 = arith.mulf %27, %26 : vector<8x32xf32>
    %29 = vector.broadcast %24 : vector<8x1xf32> to vector<8x32xf32>
    %30 = arith.mulf %28, %29 : vector<8x32xf32>
    %31 = vector.broadcast %9 : vector<1x32xf32> to vector<8x32xf32>
    %32 = arith.addf %30, %31 : vector<8x32xf32>
    %33 = arith.truncf %32 : vector<8x32xf32> to vector<8x32xbf16>
    %c0_15 = arith.constant 0 : index
    %c0_16 = arith.constant 0 : index
    %c0_17 = arith.constant 0 : index
    %34 = vector.load %arg6[%c0_15, %c0_16, %c0_17] : memref<1x32x96xbf16, #tpu.memory_space<vmem>>, vector<1x32x96xbf16>
    %35 = vector.shape_cast %34 : vector<1x32x96xbf16> to vector<32x96xbf16>
    %cst_18 = arith.constant dense<0.000000e+00> : vector<8x96xf32>
    %36 = tpu.matmul %33, %35, %cst_18 {dimension_numbers = #tpu.dot_dimension_numbers<[1], [0], [0], [1], [0, 0, 1, 1], [], []>} : vector<8x32xbf16>, vector<32x96xbf16>, vector<8x96xf32> -> vector<8x96xf32>
    %c0_19 = arith.constant 0 : index
    %c0_20 = arith.constant 0 : index
    %c0_21 = arith.constant 0 : index
    %37 = vector.load %arg7[%c0_19, %c0_20, %c0_21] : memref<1x1x96xf32, #tpu.memory_space<vmem>>, vector<1x1x96xf32>
    %38 = vector.shape_cast %37 : vector<1x1x96xf32> to vector<1x96xf32>
    %39 = vector.broadcast %38 : vector<1x96xf32> to vector<8x96xf32>
    %40 = arith.addf %36, %39 : vector<8x96xf32>
    %41 = vector.extract_strided_slice %40 {offsets = [0, 0], sizes = [8, 32], strides = [1, 1]} : vector<8x96xf32> to vector<8x32xf32>
    %cst_22 = arith.constant 0.353553385 : f32
    %42 = vector.broadcast %cst_22 : f32 to vector<8x32xf32>
    %43 = arith.mulf %41, %42 : vector<8x32xf32>
    %44 = vector.extract_strided_slice %43 {offsets = [0, 0], sizes = [8, 8], strides = [1, 1]} : vector<8x32xf32> to vector<8x8xf32>
    %45 = vector.extract_strided_slice %43 {offsets = [0, 8], sizes = [8, 8], strides = [1, 1]} : vector<8x32xf32> to vector<8x8xf32>
    %46 = vector.extract_strided_slice %43 {offsets = [0, 16], sizes = [8, 8], strides = [1, 1]} : vector<8x32xf32> to vector<8x8xf32>
    %47 = vector.extract_strided_slice %43 {offsets = [0, 24], sizes = [8, 8], strides = [1, 1]} : vector<8x32xf32> to vector<8x8xf32>
    %48 = vector.shape_cast %44 : vector<8x8xf32> to vector<1x8x8xf32>
    %49 = vector.shape_cast %45 : vector<8x8xf32> to vector<1x8x8xf32>
    %50 = vector.shape_cast %46 : vector<8x8xf32> to vector<1x8x8xf32>
    %51 = vector.shape_cast %47 : vector<8x8xf32> to vector<1x8x8xf32>
    %52 = tpu.concatenate %48, %49, %50, %51 in 0 : vector<1x8x8xf32>, vector<1x8x8xf32>, vector<1x8x8xf32>, vector<1x8x8xf32> -> vector<4x8x8xf32>
    %53 = arith.truncf %52 : vector<4x8x8xf32> to vector<4x8x8xbf16>
    %54 = vector.extract_strided_slice %40 {offsets = [0, 32], sizes = [8, 32], strides = [1, 1]} : vector<8x96xf32> to vector<8x32xf32>
    %55 = vector.extract_strided_slice %54 {offsets = [0, 0], sizes = [8, 8], strides = [1, 1]} : vector<8x32xf32> to vector<8x8xf32>
    %56 = vector.extract_strided_slice %54 {offsets = [0, 8], sizes = [8, 8], strides = [1, 1]} : vector<8x32xf32> to vector<8x8xf32>
    %57 = vector.extract_strided_slice %54 {offsets = [0, 16], sizes = [8, 8], strides = [1, 1]} : vector<8x32xf32> to vector<8x8xf32>
    %58 = vector.extract_strided_slice %54 {offsets = [0, 24], sizes = [8, 8], strides = [1, 1]} : vector<8x32xf32> to vector<8x8xf32>
    %59 = vector.shape_cast %55 : vector<8x8xf32> to vector<1x8x8xf32>
    %60 = vector.shape_cast %56 : vector<8x8xf32> to vector<1x8x8xf32>
    %61 = vector.shape_cast %57 : vector<8x8xf32> to vector<1x8x8xf32>
    %62 = vector.shape_cast %58 : vector<8x8xf32> to vector<1x8x8xf32>
    %63 = tpu.concatenate %59, %60, %61, %62 in 0 : vector<1x8x8xf32>, vector<1x8x8xf32>, vector<1x8x8xf32>, vector<1x8x8xf32> -> vector<4x8x8xf32>
    %64 = arith.truncf %63 : vector<4x8x8xf32> to vector<4x8x8xbf16>
    %65 = vector.extract_strided_slice %40 {offsets = [0, 64], sizes = [8, 32], strides = [1, 1]} : vector<8x96xf32> to vector<8x32xf32>
    %66 = vector.extract_strided_slice %65 {offsets = [0, 0], sizes = [8, 8], strides = [1, 1]} : vector<8x32xf32> to vector<8x8xf32>
    %67 = vector.extract_strided_slice %65 {offsets = [0, 8], sizes = [8, 8], strides = [1, 1]} : vector<8x32xf32> to vector<8x8xf32>
    %68 = vector.extract_strided_slice %65 {offsets = [0, 16], sizes = [8, 8], strides = [1, 1]} : vector<8x32xf32> to vector<8x8xf32>
    %69 = vector.extract_strided_slice %65 {offsets = [0, 24], sizes = [8, 8], strides = [1, 1]} : vector<8x32xf32> to vector<8x8xf32>
    %70 = vector.shape_cast %66 : vector<8x8xf32> to vector<1x8x8xf32>
    %71 = vector.shape_cast %67 : vector<8x8xf32> to vector<1x8x8xf32>
    %72 = vector.shape_cast %68 : vector<8x8xf32> to vector<1x8x8xf32>
    %73 = vector.shape_cast %69 : vector<8x8xf32> to vector<1x8x8xf32>
    %74 = tpu.concatenate %70, %71, %72, %73 in 0 : vector<1x8x8xf32>, vector<1x8x8xf32>, vector<1x8x8xf32>, vector<1x8x8xf32> -> vector<4x8x8xf32>
    %75 = arith.truncf %74 : vector<4x8x8xf32> to vector<4x8x8xbf16>
    "tpu.trace_start"() <{level = 10 : i32, message = "hqd,hkd->hqk"}> : () -> ()
    %cst_23 = arith.constant dense<0.000000e+00> : vector<4x8x8xf32>
    %76 = tpu.matmul %53, %64, %cst_23 {dimension_numbers = #tpu.dot_dimension_numbers<[2], [2], [1], [1], [0, 0, 0, 1, 1, 1], [0], [0]>} : vector<4x8x8xbf16>, vector<4x8x8xbf16>, vector<4x8x8xf32> -> vector<4x8x8xf32>
    "tpu.trace_stop"() : () -> ()
    %77 = vector.shape_cast %5 : vector<8x8xf32> to vector<1x8x8xf32>
    %cst_24 = arith.constant 0.000000e+00 : f32
    %78 = vector.broadcast %cst_24 : f32 to vector<1x8x8xf32>
    %79 = arith.cmpf oeq, %77, %78 : vector<1x8x8xf32>
    %cst_25 = arith.constant -1.000000e+09 : f32
    %80 = vector.shape_cast %79 : vector<1x8x8xi1> to vector<1x8x8xi1>
    %81 = vector.broadcast %80 : vector<1x8x8xi1> to vector<4x8x8xi1>
    %82 = vector.broadcast %cst_25 : f32 to vector<4x8x8xf32>
    %83 = arith.select %81, %82, %76 : vector<4x8x8xi1>, vector<4x8x8xf32>
    %cst_26 = arith.constant dense<0xFF800000> : vector<4x8xf32>
    %84 = vector.multi_reduction <maximumf>, %83, %cst_26 [2] : vector<4x8x8xf32> to vector<4x8xf32>
    %85 = vector.shape_cast %84 : vector<4x8xf32> to vector<4x8x1xf32>
    %86 = vector.broadcast %85 : vector<4x8x1xf32> to vector<4x8x8xf32>
    %87 = arith.subf %83, %86 : vector<4x8x8xf32>
    %88 = math.exp %87 : vector<4x8x8xf32>
    %cst_27 = arith.constant dense<0.000000e+00> : vector<4x8xf32>
    %89 = vector.multi_reduction <add>, %88, %cst_27 [2] : vector<4x8x8xf32> to vector<4x8xf32>
    %90 = vector.shape_cast %89 : vector<4x8xf32> to vector<4x8x1xf32>
    %91 = tpu.reciprocal %90 {approx = true} : vector<4x8x1xf32> -> vector<4x8x1xf32>
    %92 = vector.broadcast %91 : vector<4x8x1xf32> to vector<4x8x8xf32>
    %93 = arith.mulf %88, %92 : vector<4x8x8xf32>
    %94 = arith.truncf %93 : vector<4x8x8xf32> to vector<4x8x8xbf16>
    "tpu.trace_start"() <{level = 10 : i32, message = "hqk,hkd->hqd"}> : () -> ()
    %cst_28 = arith.constant dense<0.000000e+00> : vector<4x8x8xf32>
    %95 = tpu.matmul %94, %75, %cst_28 {dimension_numbers = #tpu.dot_dimension_numbers<[2], [1], [1], [2], [0, 0, 0, 1, 1, 2], [0], [0]>} : vector<4x8x8xbf16>, vector<4x8x8xbf16>, vector<4x8x8xf32> -> vector<4x8x8xf32>
    "tpu.trace_stop"() : () -> ()
    %96 = arith.truncf %95 : vector<4x8x8xf32> to vector<4x8x8xbf16>
    %c0_29 = arith.constant 0 : index
    %c0_30 = arith.constant 0 : index
    %c0_31 = arith.constant 0 : index
    %c0_32 = arith.constant 0 : index
    %97 = vector.load %arg8[%c0_29, %c0_30, %c0_31, %c0_32] : memref<1x4x8x32xbf16, #tpu.memory_space<vmem>>, vector<1x4x8x32xbf16>
    %98 = vector.shape_cast %97 : vector<1x4x8x32xbf16> to vector<4x8x32xbf16>
    "tpu.trace_start"() <{level = 10 : i32, message = "hqd,hde->hqe"}> : () -> ()
    %cst_33 = arith.constant dense<0.000000e+00> : vector<4x8x32xf32>
    %99 = tpu.matmul %96, %98, %cst_33 {dimension_numbers = #tpu.dot_dimension_numbers<[2], [1], [1], [2], [0, 0, 0, 1, 1, 2], [0], [0]>} : vector<4x8x8xbf16>, vector<4x8x32xbf16>, vector<4x8x32xf32> -> vector<4x8x32xf32>
    "tpu.trace_stop"() : () -> ()
    %cst_34 = arith.constant dense<0.000000e+00> : vector<8x32xf32>
    %100 = vector.multi_reduction <add>, %99, %cst_34 [0] : vector<4x8x32xf32> to vector<8x32xf32>
    %c0_35 = arith.constant 0 : index
    %c0_36 = arith.constant 0 : index
    %c0_37 = arith.constant 0 : index
    %101 = vector.load %arg9[%c0_35, %c0_36, %c0_37] : memref<1x1x32xf32, #tpu.memory_space<vmem>>, vector<1x1x32xf32>
    %102 = vector.shape_cast %101 : vector<1x1x32xf32> to vector<1x32xf32>
    %103 = vector.broadcast %102 : vector<1x32xf32> to vector<8x32xf32>
    %104 = arith.addf %100, %103 : vector<8x32xf32>
    %105 = arith.addf %3, %104 : vector<8x32xf32>
    %c0_38 = arith.constant 0 : index
    %c0_39 = arith.constant 0 : index
    %c0_40 = arith.constant 0 : index
    %106 = vector.load %arg10[%c0_38, %c0_39, %c0_40] : memref<1x1x32xf32, #tpu.memory_space<vmem>>, vector<1x1x32xf32>
    %107 = vector.shape_cast %106 : vector<1x1x32xf32> to vector<1x32xf32>
    %c0_41 = arith.constant 0 : index
    %c0_42 = arith.constant 0 : index
    %c0_43 = arith.constant 0 : index
    %108 = vector.load %arg11[%c0_41, %c0_42, %c0_43] : memref<1x1x32xf32, #tpu.memory_space<vmem>>, vector<1x1x32xf32>
    %109 = vector.shape_cast %108 : vector<1x1x32xf32> to vector<1x32xf32>
    %cst_44 = arith.constant dense<0.000000e+00> : vector<8xf32>
    %110 = vector.multi_reduction <add>, %105, %cst_44 [1] : vector<8x32xf32> to vector<8xf32>
    %111 = vector.shape_cast %110 : vector<8xf32> to vector<8x1xf32>
    %cst_45 = arith.constant 3.200000e+01 : f32
    %112 = vector.broadcast %cst_45 : f32 to vector<8x1xf32>
    %113 = arith.divf %111, %112 : vector<8x1xf32>
    %114 = vector.broadcast %113 : vector<8x1xf32> to vector<8x32xf32>
    %115 = arith.subf %105, %114 : vector<8x32xf32>
    %116 = arith.mulf %115, %115 : vector<8x32xf32>
    %cst_46 = arith.constant dense<0.000000e+00> : vector<8xf32>
    %117 = vector.multi_reduction <add>, %116, %cst_46 [1] : vector<8x32xf32> to vector<8xf32>
    %118 = vector.shape_cast %117 : vector<8xf32> to vector<8x1xf32>
    %cst_47 = arith.constant 3.100000e+01 : f32
    %119 = vector.broadcast %cst_47 : f32 to vector<8x1xf32>
    %120 = arith.divf %118, %119 : vector<8x1xf32>
    %121 = math.sqrt %120 : vector<8x1xf32>
    %cst_48 = arith.constant 9.99999997E-7 : f32
    %122 = vector.broadcast %cst_48 : f32 to vector<8x1xf32>
    %123 = arith.addf %121, %122 : vector<8x1xf32>
    %124 = tpu.reciprocal %123 {approx = true} : vector<8x1xf32> -> vector<8x1xf32>
    %125 = vector.broadcast %113 : vector<8x1xf32> to vector<8x32xf32>
    %126 = arith.subf %105, %125 : vector<8x32xf32>
    %127 = vector.broadcast %107 : vector<1x32xf32> to vector<8x32xf32>
    %128 = arith.mulf %127, %126 : vector<8x32xf32>
    %129 = vector.broadcast %124 : vector<8x1xf32> to vector<8x32xf32>
    %130 = arith.mulf %128, %129 : vector<8x32xf32>
    %131 = vector.broadcast %109 : vector<1x32xf32> to vector<8x32xf32>
    %132 = arith.addf %130, %131 : vector<8x32xf32>
    %133 = arith.truncf %132 : vector<8x32xf32> to vector<8x32xbf16>
    %c0_49 = arith.constant 0 : index
    %c0_50 = arith.constant 0 : index
    %c0_51 = arith.constant 0 : index
    %134 = vector.load %arg12[%c0_49, %c0_50, %c0_51] : memref<1x32x64xbf16, #tpu.memory_space<vmem>>, vector<1x32x64xbf16>
    %135 = vector.shape_cast %134 : vector<1x32x64xbf16> to vector<32x64xbf16>
    %cst_52 = arith.constant dense<0.000000e+00> : vector<8x64xf32>
    %136 = tpu.matmul %133, %135, %cst_52 {dimension_numbers = #tpu.dot_dimension_numbers<[1], [0], [0], [1], [0, 0, 1, 1], [], []>} : vector<8x32xbf16>, vector<32x64xbf16>, vector<8x64xf32> -> vector<8x64xf32>
    %c0_53 = arith.constant 0 : index
    %c0_54 = arith.constant 0 : index
    %c0_55 = arith.constant 0 : index
    %137 = vector.load %arg13[%c0_53, %c0_54, %c0_55] : memref<1x1x64xf32, #tpu.memory_space<vmem>>, vector<1x1x64xf32>
    %138 = vector.shape_cast %137 : vector<1x1x64xf32> to vector<1x64xf32>
    %139 = vector.broadcast %138 : vector<1x64xf32> to vector<8x64xf32>
    %140 = arith.addf %136, %139 : vector<8x64xf32>
    %cst_56 = arith.constant 0.000000e+00 : f32
    %141 = vector.broadcast %cst_56 : f32 to vector<8x64xf32>
    %142 = arith.maximumf %140, %141 : vector<8x64xf32>
    %143 = arith.truncf %142 : vector<8x64xf32> to vector<8x64xbf16>
    %c0_57 = arith.constant 0 : index
    %c0_58 = arith.constant 0 : index
    %c0_59 = arith.constant 0 : index
    %144 = vector.load %arg14[%c0_57, %c0_58, %c0_59] : memref<1x64x32xbf16, #tpu.memory_space<vmem>>, vector<1x64x32xbf16>
    %145 = vector.shape_cast %144 : vector<1x64x32xbf16> to vector<64x32xbf16>
    %cst_60 = arith.constant dense<0.000000e+00> : vector<8x32xf32>
    %146 = tpu.matmul %143, %145, %cst_60 {dimension_numbers = #tpu.dot_dimension_numbers<[1], [0], [0], [1], [0, 0, 1, 1], [], []>} : vector<8x64xbf16>, vector<64x32xbf16>, vector<8x32xf32> -> vector<8x32xf32>
    %c0_61 = arith.constant 0 : index
    %c0_62 = arith.constant 0 : index
    %c0_63 = arith.constant 0 : index
    %147 = vector.load %arg15[%c0_61, %c0_62, %c0_63] : memref<1x1x32xf32, #tpu.memory_space<vmem>>, vector<1x1x32xf32>
    %148 = vector.shape_cast %147 : vector<1x1x32xf32> to vector<1x32xf32>
    %149 = vector.broadcast %148 : vector<1x32xf32> to vector<8x32xf32>
    %150 = arith.addf %146, %149 : vector<8x32xf32>
    %151 = arith.addf %105, %150 : vector<8x32xf32>
    %c0_64 = arith.constant 0 : index
    %c0_65 = arith.constant 0 : index
    %152 = vector.load %arg19[%c0_64, %c0_65] : memref<8x32xf32, #tpu.memory_space<vmem>>, vector<8x32xf32>
    tpu.vector_store %arg19[%c0_64, %c0_65], %151 {strides = array<i32>} : memref<8x32xf32, #tpu.memory_space<vmem>>, vector<8x32xf32>,
    %c1_i32 = arith.constant 1 : i32
    %153 = arith.cmpi eq, %arg1, %c1_i32 : i32
    %154 = arith.extui %153 : i1 to i32
    %c0_i32_66 = arith.constant 0 : i32
    %155 = arith.cmpi ne, %154, %c0_i32_66 : i32
    scf.if %155 {
      %c0_67 = arith.constant 0 : index
      %c0_68 = arith.constant 0 : index
      %156 = vector.load %arg16[%c0_67, %c0_68] : memref<1x32xf32, #tpu.memory_space<vmem>>, vector<1x32xf32>
      %c0_69 = arith.constant 0 : index
      %c0_70 = arith.constant 0 : index
      %157 = vector.load %arg17[%c0_69, %c0_70] : memref<1x32xf32, #tpu.memory_space<vmem>>, vector<1x32xf32>
      %cst_71 = arith.constant dense<0.000000e+00> : vector<8xf32>
      %158 = vector.multi_reduction <add>, %151, %cst_71 [1] : vector<8x32xf32> to vector<8xf32>
      %159 = vector.shape_cast %158 : vector<8xf32> to vector<8x1xf32>
      %cst_72 = arith.constant 3.200000e+01 : f32
      %160 = vector.broadcast %cst_72 : f32 to vector<8x1xf32>
      %161 = arith.divf %159, %160 : vector<8x1xf32>
      %162 = vector.broadcast %161 : vector<8x1xf32> to vector<8x32xf32>
      %163 = arith.subf %151, %162 : vector<8x32xf32>
      %164 = arith.mulf %163, %163 : vector<8x32xf32>
      %cst_73 = arith.constant dense<0.000000e+00> : vector<8xf32>
      %165 = vector.multi_reduction <add>, %164, %cst_73 [1] : vector<8x32xf32> to vector<8xf32>
      %166 = vector.shape_cast %165 : vector<8xf32> to vector<8x1xf32>
      %cst_74 = arith.constant 3.100000e+01 : f32
      %167 = vector.broadcast %cst_74 : f32 to vector<8x1xf32>
      %168 = arith.divf %166, %167 : vector<8x1xf32>
      %169 = math.sqrt %168 : vector<8x1xf32>
      %cst_75 = arith.constant 9.99999997E-7 : f32
      %170 = vector.broadcast %cst_75 : f32 to vector<8x1xf32>
      %171 = arith.addf %169, %170 : vector<8x1xf32>
      %172 = tpu.reciprocal %171 {approx = true} : vector<8x1xf32> -> vector<8x1xf32>
      %173 = vector.broadcast %161 : vector<8x1xf32> to vector<8x32xf32>
      %174 = arith.subf %151, %173 : vector<8x32xf32>
      %175 = vector.broadcast %156 : vector<1x32xf32> to vector<8x32xf32>
      %176 = arith.mulf %175, %174 : vector<8x32xf32>
      %177 = vector.broadcast %172 : vector<8x1xf32> to vector<8x32xf32>
      %178 = arith.mulf %176, %177 : vector<8x32xf32>
      %179 = vector.broadcast %157 : vector<1x32xf32> to vector<8x32xf32>
      %180 = arith.addf %178, %179 : vector<8x32xf32>
      %c0_76 = arith.constant 0 : index
      %c0_77 = arith.constant 0 : index
      %c0_78 = arith.constant 0 : index
      %181 = vector.load %arg18[%c0_76, %c0_77, %c0_78] : memref<1x8x32xf32, #tpu.memory_space<vmem>>, vector<1x8x32xf32>
      %182 = vector.shape_cast %181 : vector<1x8x32xf32> to vector<8x32xf32>
      %183 = vector.shape_cast %180 : vector<8x32xf32> to vector<1x8x32xf32>
      tpu.vector_store %arg18[%c0_76, %c0_77, %c0_78], %183 {strides = array<i32>} : memref<1x8x32xf32, #tpu.memory_space<vmem>>, vector<1x8x32xf32>,
    } else {
    }
    return
  }
  func.func @transform_0(%arg0: i32, %arg1: i32) -> (i32, i32, i32) {
    %c0_i32 = arith.constant 0 : i32
    %c0_i32_0 = arith.constant 0 : i32
    %c0_i32_1 = arith.constant 0 : i32
    return %arg0, %c0_i32, %c0_i32_0 : i32, i32, i32
  }
  func.func @transform_1(%arg0: i32, %arg1: i32) -> (i32, i32, i32) {
    %c0_i32 = arith.constant 0 : i32
    %c0_i32_0 = arith.constant 0 : i32
    %c0_i32_1 = arith.constant 0 : i32
    return %arg0, %c0_i32, %c0_i32_0 : i32, i32, i32
  }
  func.func @transform_2(%arg0: i32, %arg1: i32) -> (i32, i32, i32) {
    %c0_i32 = arith.constant 0 : i32
    %c0_i32_0 = arith.constant 0 : i32
    %c0_i32_1 = arith.constant 0 : i32
    return %arg1, %c0_i32, %c0_i32_0 : i32, i32, i32
  }
  func.func @transform_3(%arg0: i32, %arg1: i32) -> (i32, i32, i32) {
    %c0_i32 = arith.constant 0 : i32
    %c0_i32_0 = arith.constant 0 : i32
    %c0_i32_1 = arith.constant 0 : i32
    return %arg1, %c0_i32, %c0_i32_0 : i32, i32, i32
  }
  func.func @transform_4(%arg0: i32, %arg1: i32) -> (i32, i32, i32) {
    %c0_i32 = arith.constant 0 : i32
    %c0_i32_0 = arith.constant 0 : i32
    %c0_i32_1 = arith.constant 0 : i32
    return %arg1, %c0_i32, %c0_i32_0 : i32, i32, i32
  }
  func.func @transform_5(%arg0: i32, %arg1: i32) -> (i32, i32, i32) {
    %c0_i32 = arith.constant 0 : i32
    %c0_i32_0 = arith.constant 0 : i32
    %c0_i32_1 = arith.constant 0 : i32
    return %arg1, %c0_i32, %c0_i32_0 : i32, i32, i32
  }
  func.func @transform_6(%arg0: i32, %arg1: i32) -> (i32, i32, i32, i32) {
    %c0_i32 = arith.constant 0 : i32
    %c0_i32_0 = arith.constant 0 : i32
    %c0_i32_1 = arith.constant 0 : i32
    %c0_i32_2 = arith.constant 0 : i32
    return %arg1, %c0_i32, %c0_i32_0, %c0_i32_1 : i32, i32, i32, i32
  }
  func.func @transform_7(%arg0: i32, %arg1: i32) -> (i32, i32, i32) {
    %c0_i32 = arith.constant 0 : i32
    %c0_i32_0 = arith.constant 0 : i32
    %c0_i32_1 = arith.constant 0 : i32
    return %arg1, %c0_i32, %c0_i32_0 : i32, i32, i32
  }
  func.func @transform_8(%arg0: i32, %arg1: i32) -> (i32, i32, i32) {
    %c0_i32 = arith.constant 0 : i32
    %c0_i32_0 = arith.constant 0 : i32
    %c0_i32_1 = arith.constant 0 : i32
    return %arg1, %c0_i32, %c0_i32_0 : i32, i32, i32
  }
  func.func @transform_9(%arg0: i32, %arg1: i32) -> (i32, i32, i32) {
    %c0_i32 = arith.constant 0 : i32
    %c0_i32_0 = arith.constant 0 : i32
    %c0_i32_1 = arith.constant 0 : i32
    return %arg1, %c0_i32, %c0_i32_0 : i32, i32, i32
  }
  func.func @transform_10(%arg0: i32, %arg1: i32) -> (i32, i32, i32) {
    %c0_i32 = arith.constant 0 : i32
    %c0_i32_0 = arith.constant 0 : i32
    %c0_i32_1 = arith.constant 0 : i32
    return %arg1, %c0_i32, %c0_i32_0 : i32, i32, i32
  }
  func.func @transform_11(%arg0: i32, %arg1: i32) -> (i32, i32, i32) {
    %c0_i32 = arith.constant 0 : i32
    %c0_i32_0 = arith.constant 0 : i32
    %c0_i32_1 = arith.constant 0 : i32
    return %arg1, %c0_i32, %c0_i32_0 : i32, i32, i32
  }
  func.func @transform_12(%arg0: i32, %arg1: i32) -> (i32, i32, i32) {
    %c0_i32 = arith.constant 0 : i32
    %c0_i32_0 = arith.constant 0 : i32
    %c0_i32_1 = arith.constant 0 : i32
    return %arg1, %c0_i32, %c0_i32_0 : i32, i32, i32
  }
  func.func @transform_13(%arg0: i32, %arg1: i32) -> (i32, i32, i32) {
    %c0_i32 = arith.constant 0 : i32
    %c0_i32_0 = arith.constant 0 : i32
    %c0_i32_1 = arith.constant 0 : i32
    return %arg1, %c0_i32, %c0_i32_0 : i32, i32, i32
  }
  func.func @transform_14(%arg0: i32, %arg1: i32) -> (i32, i32) {
    %c0_i32 = arith.constant 0 : i32
    %c0_i32_0 = arith.constant 0 : i32
    %c0_i32_1 = arith.constant 0 : i32
    return %c0_i32, %c0_i32_0 : i32, i32
  }
  func.func @transform_15(%arg0: i32, %arg1: i32) -> (i32, i32) {
    %c0_i32 = arith.constant 0 : i32
    %c0_i32_0 = arith.constant 0 : i32
    %c0_i32_1 = arith.constant 0 : i32
    return %c0_i32, %c0_i32_0 : i32, i32
  }
  func.func @transform_16(%arg0: i32, %arg1: i32) -> (i32, i32, i32) {
    %c0_i32 = arith.constant 0 : i32
    %c0_i32_0 = arith.constant 0 : i32
    %c0_i32_1 = arith.constant 0 : i32
    return %arg0, %c0_i32, %c0_i32_0 : i32, i32, i32
  }
}

</mosaic_0001>

<bundles_post_ra>
// kernel: tpu_custom_call.1
= control target key start
LH: loop header
LB: loop body
LE: loop exit
PB: predicated region body
PF: predicated region fallthrough
CT: control target
= control target key end

     0   :  { %s3325_s0 = inlined_call_operand.hbm [shape: f32[2,8,32], index: 0, kind: input, shape index: {}]   ;;  %s3326_s1 = inlined_call_operand.hbm [shape: f32[2,8,8], index: 1, kind: input, shape index: {}]   ;;  %s3327_s2 = inlined_call_operand.vmem [shape: f32[2,1,32], index: 2, kind: input, shape index: {}]   ;;  %s3328_s3 = inlined_call_operand.vmem [shape: f32[2,1,32], index: 3, kind: input, shape index: {}]   ;;  %s3329_s4 = inlined_call_operand.vmem [shape: bf16[2,32,96], index: 4, kind: input, shape index: {}]   ;;  %s3330_s5 = inlined_call_operand.vmem [shape: f32[2,1,96], index: 5, kind: input, shape index: {}]   ;;  %s3331_s6 = inlined_call_operand.vmem [shape: bf16[2,4,8,32], index: 6, kind: input, shape index: {}]   ;;  %s3332_s7 = inlined_call_operand.vmem [shape: f32[2,1,32], index: 7, kind: input, shape index: {}]   ;;  %s3333_s8 = inlined_call_operand.vmem [shape: f32[2,1,32], index: 8, kind: input, shape index: {}]   ;;  %s3334_s9 = inlined_call_operand.vmem [shape: f32[2,1,32], index: 9, kind: input, shape index: {}]   ;;  %s3335_s10 = inlined_call_operand.vmem [shape: bf16[2,32,64], index: 10, kind: input, shape index: {}]   ;;  %s3336_s11 = inlined_call_operand.hbm [shape: f32[2,1,64], index: 11, kind: input, shape index: {}]   ;;  %s3337_s12 = inlined_call_operand.vmem [shape: bf16[2,64,32], index: 12, kind: input, shape index: {}]   ;;  %s3338_s13 = inlined_call_operand.vmem [shape: f32[2,1,32], index: 13, kind: input, shape index: {}]   ;;  %s3339_s14 = inlined_call_operand.vmem [shape: f32[1,32], index: 14, kind: input, shape index: {}]   ;;  %s3340_s15 = inlined_call_operand.vmem [shape: f32[1,32], index: 15, kind: input, shape index: {}]   ;;  %s3341_s16 = inlined_call_operand.hbm [shape: f32[2,8,32], index: 16, kind: output, shape index: {}]  }
   0x1   :  { %3367 = sst [smem:[#allocation30_spill]] %s3325_s0 }
   0x2   :  { %3368 = sst [smem:[#allocation31_spill]] %s3326_s1 }
   0x3   :  { %3369 = sst [smem:[#allocation32_spill]] %s3329_s4 }
   0x4   :  { %3370 = sst [smem:[#allocation33_spill]] %s3330_s5 }
   0x5   :  { %3371 = sst [smem:[#allocation34_spill]] %s3331_s6 }
   0x6   :  { %3372 = sst [smem:[#allocation35_spill]] %s3332_s7 }
   0x7   :  { %3373 = sst [smem:[#allocation36_spill]] %s3333_s8 }
   0x8   :  { %3374 = sst [smem:[#allocation37_spill]] %s3334_s9 }
   0x9   :  { %3375 = sst [smem:[#allocation38_spill]] %s3335_s10 }
   0xa   :  { %3376 = sst [smem:[#allocation39_spill]] %s3336_s11 }
   0xb   :  { %3377 = sst [smem:[#allocation40_spill]] %s3337_s12 }
   0xc   :  { %3378 = sst [smem:[#allocation41_spill]] %s3338_s13 }
   0xd   :  { %3379 = sst [smem:[#allocation42_spill]] %s3339_s14 }
   0xe   :  { %3380 = sst [smem:[#allocation43_spill]] %s3340_s15 }
   0xf   :  { %3381 = sst [smem:[#allocation44_spill]] %s3341_s16 }
  0x10   :  { %21 = vsyncpa [#allocation4], 0 }
  0x11   :  { %23 = vsyncpa [#allocation4 + $0x1], 0 }
  0x12   :  { %24 = vsyncpa [#allocation7], 0 }
  0x13   :  { %26 = vsyncpa [#allocation7 + $0x1], 0 }
  0x14   :  { %27 = vsyncpa [#allocation5], 0 }
  0x15   :  { %29 = vsyncpa [#allocation5 + $0x1], 0  ;;  %s2742_s21 = smov 0   ;;  %s2744_s22 = smov 0  }
  0x16   :  { %s2746_s23 = smov 0   ;;  %s2748_s24 = smov 0  }
  0x17   :  { %s2750_s25 = smov 0   ;;  %s2752_s26 = smov 0  }
  0x18   :  { %s2754_s27 = smov 0   ;;  %s2756_s28 = smov 0  }
  0x19   :  { %s2758_s29 = smov 0   ;;  %s2760_s30 = smov 0  }
  0x1a   :  { %s2762_s0 = smov 0  }
  0x1b LB: > { %3382 = sst [smem:[#allocation14_spill]] %s2608_s22  ;;  %s2798_s17 = sadd.s32 4294967295, %s2644_s0   ;;  %s2644_s0 = sphi %s2762_s0, %s35_s0   ;;  %s2640_s30 = sphi %s2760_s30, %s3459_s30   ;;  %s2636_s29 = sphi %s2758_s29, %s3458_s29   ;;  %s2632_s28 = sphi %s2756_s28, %s3457_s28   ;;  %s2628_s27 = sphi %s2754_s27, %s3456_s27   ;;  %s2624_s26 = sphi %s2752_s26, %s3455_s26   ;;  %s2620_s25 = sphi %s2750_s25, %s3454_s25   ;;  %s2616_s24 = sphi %s2748_s24, %s3453_s24   ;;  %s2612_s23 = sphi %s2746_s23, %s3452_s23   ;;  %s2608_s22 = sphi %s2744_s22, %s3451_s22   ;;  %s2604_s21 = sphi %s2742_s21, %s3450_s21  }
  0x1c   : > { %3383 = sst [smem:[#allocation15_spill]] %s2612_s23  ;;  %s2071_s18 = sadd.s32 4294967294, %s2644_s0  }
  0x1d   : > { %3384 = sst [smem:[#allocation16_spill]] %s2616_s24  ;;  %p61_p0 = scmp.ne.s32.totalorder %s2624_s26, %s2620_s25 }
  0x1e   : > { %3385 = sst [smem:[#allocation17_spill]] %s2620_s25  ;;  %p3352_p1 = scmp.eq.s32.totalorder %s2644_s0, 0 }
  0x1f   : > { %3386 = sst [smem:[#allocation18_spill]] %s2624_s26  ;;  %p67_p2 = scmp.ne.s32.totalorder %s2620_s25, %s2616_s24 }
  0x20   : > { %3387 = sst [smem:[#allocation19_spill]] %s2632_s28  ;;  %p3351_p3 = scmp.eq.s32.totalorder %s2798_s17, 0 }
  0x21   : > { %3388 = sst [smem:[#allocation20_spill]] %s2636_s29  ;;  %p63_p4 = por %p3352_p1, %p61_p0 }
  0x22   : > { %3389 = sst [smem:[#allocation21_spill]] %s2640_s30  ;;  %p471_p5 = scmp.eq.s32.totalorder %s2798_s17, 3 }
  0x23   : > { %3390 = sst [smem:[#allocation22_spill]] %s2644_s0  ;;  %p2814_p6 = por %p3351_p3, %p67_p2 }
  0x24   : > { %p477_p7 = scmp.eq.s32.totalorder %s2071_s18, 3  ;;  %p2818_p8 = por %p471_p5, %p61_p0 }
  0x25   : > { %s3391_s16 = scalar_select %p2814_p6, 1, 0 }
  0x26   : > { %s3392_s19 = scalar_select %p2818_p8, 1, 0 }
  0x27   : > { %p2822_p9 = por %p477_p7, %p67_p2  ;;  %p3350_p10 = scmp.lt.s32.totalorder %s2644_s0, 4 }
  0x28   : > { %3393 = sst [smem:[#allocation23_spill]] %s3392_s19  ;;  %s3348_s24 = sand.u32 1, %s2624_s26  }
  0x29   : > { %s3394_s20 = scalar_select %p2822_p9, 1, 0 }
  0x2a   : > { %s3349_s28 = sshll.u32 %s2640_s30, 7  ;;  %s2831_s15 = sshll.u32 %s3348_s24, 3 }
  0x2b   : > { %3395 = sst [smem:[#allocation24_spill]] %s3394_s20  ;;  %p2835_p11 = pnand %p3350_p10, %p63_p4 }
  0x2c   : > { %s521_s18 = sand.u32 1, %s2644_s0   ;;  %s3397_s1 = sld [smem:[#allocation31_spill]] }
  0x2d   : > { %s525_s24 = scalar_lea.vmem [#allocation6], %s2831_s15  ;;  %s2851_s10 = scalar_lea.sflag [#allocation7], %s521_s18 }
  0x2e   : > { %s532_s13 = sshll.u32 %s525_s24, 4  ;;  %p2426_p0 = pneg %p2835_p11  ;;  %s2848_s13 = int_to_ptr.vmem [resolvable:$true] %s532_s13 }
  0x32   : > { %s2845_s20 = scalar_lea.hbm %s3397_s1, %s3349_s28  ;;  %s2429_s28 = scalar_lea.hbm %s3397_s1, 256 }
  0x33   : > { %s2424_s9 = scalar_lea.hbm %s2845_s20, 128  ;;  %p2430_p5 = scmp.lt.u32.totalorder %s2845_s20, %s3397_s1 }
  0x34   : > { %p2425_p13 = scmp.ne.s32.totalorder %s2845_s20, %s2424_s9  ;;  %p2431_p7 = scmp.lt.u32.totalorder %s2429_s28, %s2424_s9 }
  0x35   : > { %p2433_p3 = scmp.lt.u32.totalorder %s2424_s9, %s2845_s20 }
  0x36   : > { %p2427_p2 = pnand %p2426_p0, %p2425_p13  ;;  %p2432_p10 = por %p2431_p7, %p2430_p5 }
  0x38   : > { %p2428_p4 = pneg %p2427_p2  ;;  %p2434_p1 = por %p2433_p3, %p2432_p10 }
  0x3a   : > { %p2435_p12 = pnand %p2434_p1, %p2428_p4 }
  0x3c   : > { %2438 = shalt.err (!%p2435_p12)
}
  0x3d   : > { %s2439_s24 = scalar_lea.vmem %s2848_s13, 128  ;;  %s2646_s18 = smov [#allocation6]  }
  0x3e   : > { %p2440_p13 = scmp.ne.s32.totalorder %s2848_s13, %s2439_s24  ;;  %s2444_s12 = sshll.u32 %s2646_s18, 4  ;;  %s2445_s12 = int_to_ptr.vmem [resolvable:$false] %s2444_s12 }
  0x3f   : > { %s2446_s7 = scalar_lea.vmem %s2445_s12, 256  ;;  %p2447_p8 = scmp.lt.s32.totalorder %s2848_s13, %s2445_s12 }
  0x40   : > { %p2442_p2 = pnand %p2440_p13, %p2426_p0  ;;  %p2448_p5 = scmp.lt.s32.totalorder %s2446_s7, %s2439_s24 }
  0x42   : > { %p2443_p9 = pneg %p2442_p2  ;;  %p2449_p7 = por %p2448_p5, %p2447_p8 }
  0x44   : > { %p2450_p3 = pnand %p2449_p7, %p2443_p9 }
  0x46   : > { %2453 = shalt.err (!%p2450_p3)
}
  0x47   : > { %2283 = dma.hbm_to_vmem [thread:$0]  (!%p2835_p11), %s2845_s20, 128, %s2848_s13, %s2851_s10  }
  0x48   : > { %p628_p1 = scmp.lt.s32.totalorder %s2644_s0, 5  ;;  %p3398_p10 = scmp.ge.s32.totalorder %s2644_s0, 1 }
  0x49   : > { %s3400_s9 = sshll.u32 %s2640_s30, 7  ;;  %s3401_s24 = sld [smem:[#allocation30_spill]] }
  0x4a   : > { %p2882_p12 = pnand %p3398_p10, %p628_p1  ;;  %s507_s7 = scalar_lea.vmem [#allocation3], %s2831_s15 }
  0x4b   : > { %s514_s1 = sshll.u32 %s507_s7, 4  ;;  %s3403_s13 = sand.u32 1, %s2624_s26   ;;  %s515_s1 = int_to_ptr.vmem [resolvable:$true] %s514_s1 }
  0x4c   : > { %s3399_s8 = scalar_select %p2882_p12, 1, 0 }
  0x4d   : > { %s504_s20 = scalar_lea.sflag [#allocation4], %s3403_s13 }
  0x4f   : > { %s3402_s18 = smov %s3401_s24  ;;  %s2891_s12 = scalar_lea.hbm %s3401_s24, %s3400_s9 }
  0x50   : > { %s2454_s6 = scalar_lea.hbm %s2891_s12, 128  ;;  %s2459_s9 = scalar_lea.hbm %s3402_s18, 256 }
  0x51   : > { %p2455_p8 = scmp.ne.s32.totalorder %s2891_s12, %s2454_s6  ;;  %p2460_p13 = scmp.lt.u32.totalorder %s2891_s12, %s3402_s18 }
  0x52   : > { %p2461_p2 = scmp.lt.u32.totalorder %s2459_s9, %s2454_s6  ;;  %p2463_p7 = scmp.lt.u32.totalorder %s2454_s6, %s2891_s12 }
  0x53   : > { %p2457_p9 = pnand %p2455_p8, %p2426_p0 }
  0x54   : > { %p2462_p5 = por %p2461_p2, %p2460_p13 }
  0x55   : > { %p2458_p4 = pneg %p2457_p9 }
  0x56   : > { %p2464_p3 = por %p2463_p7, %p2462_p5 }
  0x58   : > { %p2465_p1 = pnand %p2464_p3, %p2458_p4 }
  0x5a   : > { %2468 = shalt.err (!%p2465_p1)
}
  0x5b   : > { %s2469_s15 = scalar_lea.vmem %s515_s1, 128  ;;  %s2647_s24 = smov [#allocation3]  }
  0x5c   : > { %p2470_p10 = scmp.ne.s32.totalorder %s515_s1, %s2469_s15  ;;  %s2474_s4 = sshll.u32 %s2647_s24, 4  ;;  %s2475_s4 = int_to_ptr.vmem [resolvable:$false] %s2474_s4 }
  0x5d   : > { %s2476_s5 = scalar_lea.vmem %s2475_s4, 256  ;;  %p2477_p6 = scmp.lt.s32.totalorder %s515_s1, %s2475_s4 }
  0x5e   : > { %p2472_p8 = pnand %p2470_p10, %p2426_p0  ;;  %p2478_p12 = scmp.lt.s32.totalorder %s2476_s5, %s2469_s15 }
  0x60   : > { %p2473_p9 = pneg %p2472_p8  ;;  %p2479_p2 = por %p2478_p12, %p2477_p6 }
  0x62   : > { %p2480_p13 = pnand %p2479_p2, %p2473_p9 }
  0x64   : > { %2483 = shalt.err (!%p2480_p13)
}
  0x65   : > { %2280 = dma.hbm_to_vmem [thread:$0]  (!%p2835_p11), %s2891_s12, 128, %s515_s1, %s504_s20  }
  0x66   : > { %s44_s6 = sadd.s32 1, %s2636_s29  ;;  %s340_s14 = sadd.s32 1, %s2612_s23 }
  0x67   : > { %p45_p6 = scmp.ge.s32.totalorder %s44_s6, 2  ;;  %p347_p0 = scmp.ne.s32.totalorder %s2612_s23, %s2608_s22 }
  0x68   : > { %p353_p12 = scmp.ne.s32.totalorder %s2608_s22, %s2604_s21  ;;  %s3405_s7 = sadd.s32 1, %s2640_s30 }
  0x69   : > { %s3461_s6 = smov (%p45_p6, %s44_s6), 0  ;;  %s3463_s7 = smov (!%p45_p6, %s3405_s7), %s2640_s30 }
  0x6a   : > { %3404 = sst [smem:[#allocation25_spill]] %s3461_s6  ;;  %s337_s13 = ssub.s32 %s2636_s29, %s3461_s6 }
  0x6b   : > { %p3406_p4 = scmp.eq.s32.totalorder %s2644_s0, 0  ;;  %p49_p11 = scmp.ge.s32.totalorder %s3463_s7, 2 }
  0x6c   : > { %p338_p7 = scmp.eq.s32.totalorder %s337_s13, 0  ;;  %p3408_p3 = scmp.eq.s32.totalorder %s2798_s17, 0 }
  0x6d   : > { %p2930_p5 = por %p347_p0, %p3406_p4  ;;  %s601_s21 = sand.u32 1, %s2612_s23  }
  0x6e   : > { %p2936_p1 = por %p353_p12, %p3408_p3  ;;  %s3465_s7 = smov (%p49_p11, %s3463_s7), 0 }
  0x6f   : > { %3410 = sst [smem:[#allocation26_spill]] %s3465_s7  ;;  %s51_s20 = ssub.s32 %s2640_s30, %s3465_s7 }
  0x70   : > { %s2944_s12 = scalar_select %p338_p7, %s2612_s23, %s340_s14  }
  0x71   : > { %p52_p10 = scmp.eq.s32.totalorder %s51_s20, 0  ;;  %s2078_s28 = sshll.u32 %s2636_s29, 4 }
  0x72   : > { %3411 = sst [smem:[#allocation27_spill]] %s2944_s12  ;;  %s3412_s11 = sld [smem:[#allocation39_spill]] }
  0x73   : > { %s602_s4 = scalar_lea.vmem [#allocation8], %s601_s21  ;;  %s3413_s13 = sadd.s32 1, %s2624_s26 }
  0x74   : > { %s609_s5 = sshll.u32 %s602_s4, 4  ;;  %p3415_p8 = scmp.lt.s32.totalorder %s2644_s0, 4  ;;  %s2959_s5 = int_to_ptr.vmem [resolvable:$true] %s609_s5 }
  0x75   : > { %s2957_s18 = scalar_select %p52_p10, %s2624_s26, %s3413_s13  }
  0x76   : > { %p2965_p9 = pnand %p3415_p8, %p2930_p5 }
  0x77   : > { %3414 = sst [smem:[#allocation28_spill]] %s2957_s18 }
  0x78   : > { %s2952_s24 = scalar_lea.hbm %s3412_s11, %s2078_s28  ;;  %p2486_p13 = pneg %p2965_p9 }
  0x79   : > { %s2484_s20 = scalar_lea.hbm %s2952_s24, 16  ;;  %s2489_s19 = scalar_lea.hbm %s3412_s11, 32 }
  0x7a   : > { %p2485_p2 = scmp.ne.s32.totalorder %s2952_s24, %s2484_s20  ;;  %p2490_p12 = scmp.lt.u32.totalorder %s2952_s24, %s3412_s11 }
  0x7b   : > { %p2491_p4 = scmp.lt.u32.totalorder %s2489_s19, %s2484_s20  ;;  %p2493_p11 = scmp.lt.u32.totalorder %s2484_s20, %s2952_s24 }
  0x7c   : > { %p2487_p6 = pnand %p2486_p13, %p2485_p2 }
  0x7d   : > { %p2492_p5 = por %p2491_p4, %p2490_p12 }
  0x7e   : > { %p2488_p0 = pneg %p2487_p6 }
  0x7f   : > { %p2494_p7 = por %p2493_p11, %p2492_p5 }
  0x81   : > { %p2495_p3 = pnand %p2494_p7, %p2488_p0 }
  0x83   : > { %2498 = shalt.err (!%p2495_p3)
}
  0x84   : > { %s2499_s4 = scalar_lea.vmem %s2959_s5, 16  ;;  %s2648_s13 = smov [#allocation8]  }
  0x85   : > { %p2500_p10 = scmp.ne.s32.totalorder %s2959_s5, %s2499_s4  ;;  %s2504_s21 = sshll.u32 %s2648_s13, 4  ;;  %s2505_s21 = int_to_ptr.vmem [resolvable:$false] %s2504_s21 }
  0x86   : > { %s2506_s28 = scalar_lea.vmem %s2505_s21, 32  ;;  %p2507_p6 = scmp.lt.s32.totalorder %s2959_s5, %s2505_s21 }
  0x87   : > { %p2502_p8 = pnand %p2500_p10, %p2486_p13  ;;  %p2508_p12 = scmp.lt.s32.totalorder %s2506_s28, %s2499_s4 }
  0x89   : > { %p2503_p2 = pneg %p2502_p8  ;;  %p2509_p4 = por %p2508_p12, %p2507_p6 }
  0x8b   : > { %p2510_p5 = pnand %p2509_p4, %p2503_p2 }
  0x8d   : > { %2513 = shalt.err (!%p2510_p5)
}
  0x8e   : > { %2286 = dma.hbm_to_vmem [thread:$0]  (!%p2965_p9), %s2952_s24, 16, %s2959_s5, %s2851_s10  }
  0x8f   : > { %p3417_p0 = scmp.ne.s32.totalorder %s3399_s8, 0 }
  0x91   : > { %632 = sbr.rel (%p3417_p0) target bundleno = 3047 (0xbe7), region = 84 }
  0x98   : > { %s2998_s20 = sand.u32 1, %s2620_s25   ;;  %p3419_p13 = scmp.ne.s32.totalorder %s3391_s16, 0 }
  0x99   : > { %3418 = sst [smem:[#allocation29_spill]] %s2998_s20  ;;  %s3001_s19 = sshll.u32 %s2998_s20, 3 }
  0x9a   : > { %s635_s9 = scalar_lea.sflag [#allocation4], %s2998_s20  ;;  %s638_s15 = scalar_lea.vmem [#allocation3], %s3001_s19 }
  0x9b   : > { %2587 = dma.done.wait (%p3419_p13), %s635_s9, 128  }
  0x9c   : > { %2589 = vsyncadd (%p3419_p13), %s635_s9, 4294967168  ;;  %s643_s10 = sand.u32 1, %s2798_s17  }
  0x9d   : > { %s644_s8 = scalar_lea.sflag [#allocation7], %s643_s10 }
  0x9e   : > { %2591 = dma.done.wait (%p3419_p13), %s644_s8, 128  }
  0x9f   : > { %2593 = vsyncadd (%p3419_p13), %s644_s8, 4294967168  ;;  %s654_s5 = sand.u32 1, %s2608_s22  }
  0xa0   : > { %s3016_s14 = scalar_lea.vmem [#allocation8], %s654_s5 }
  0xa1   : > { %2595 = dma.done.wait (%p2936_p1), %s644_s8, 16  }
  0xa2   : > { %2597 = vsyncadd (%p2936_p1), %s644_s8, 4294967280  ;;  %p754_p9 = scmp.lt.s32.totalorder %s2628_s27, 1  ;;  %s3421_s16 = sld [smem:[#allocation32_spill]] }
  0xa3   : > { %s3422_s29 = sld [smem:[#allocation34_spill]]  ;;  %s3424_s12 = sld [smem:[#allocation36_spill]] }
  0xa4   : > { %s3024_s17 = scalar_select %p754_p9, %s2628_s27, 1 }
  0xa5   : > { %s3425_s5 = sld [smem:[#allocation37_spill]]  ;;  %s3427_s0 = sld [smem:[#allocation41_spill]] }
  0xa6   : > { %s2130_s9 = sshll.u32 %s3024_s17, 4  ;;  %s2133_s30 = sshll.u32 %s3024_s17, 5 }
  0xa7   : > { %s3428_s1 = sld [smem:[#allocation40_spill]]  ;;  %p2091_p1 = scmp.ne.s32.totalorder %s2628_s27, 0 }
  0xa8   : > { %s3042_s7 = scalar_lea.vmem %s3421_s16, %s2130_s9  ;;  %s3426_s16 = sld [smem:[#allocation38_spill]]  ;;  %v800_v0 = vld [vmem:[%s638_s15] sm:$0xff] (!%p2091_p1)  ;;  %vm801_vm0 = vcmask (!%p2091_p1), 261120  }
  0xa9   : > { %s3047_s18 = scalar_lea.vmem %s3422_s29, %s2130_s9  ;;  %s778_s23 = scalar_lea.vmem %s3424_s12, %s3024_s17  ;;  %802 = vst.msk [vmem:[#allocation2] sm:$0xff] (!%p2091_p1), %vm801_vm0, %v800_v0 }
  0xaa   : > { %s753_s12 = scalar_lea.vmem [#allocation9], %s3001_s19  ;;  %799 = sbr.rel (%p2091_p1) target bundleno = 177 (0xb1), region = 100 }
  0xab   : > { %s781_s24 = scalar_lea.vmem %s3425_s5, %s3024_s17  ;;  %s794_s20 = scalar_lea.vmem %s3427_s0, %s3024_s17 }
  0xad   : > { %s3074_s13 = scalar_lea.vmem %s3428_s1, %s2133_s30 }
  0xae   : > { %s3064_s22 = scalar_lea.vmem %s3426_s16, %s2130_s9 }
  0xb1 PF: > { %v3078_v1 = vld [vmem:[#allocation2] sm:$0xff]  ;;  %vm807_vm1 = vcmask 261120   ;;  %v2649_v9 = vmov 0.0   ;;  %vm2650_vm2 = vmmov 0   ;;  %v2389_v10 = vld [vmem:[%s3042_s7 + $0x8] sm:$0xff]   ;;  %s3429_s15 = scalar_lea.vmem %s3327_s2, %s3024_s17  ;;  %s3430_s21 = scalar_lea.vmem %s3328_s3, %s3024_s17  ;;  %vm943_vm5 = vcmask 64512  }
  0xb2   : > { %v808_v2 = vsel %vm807_vm1, %v3078_v1, 0.0  ;;  %v2388_v8 = vld [vmem:[%s3042_s7] sm:$0xff]   ;;  %2169 = vmatprep.subr.bf16.mxu1 %v2649_v9  ;;  %2173 = vmatprep.mubr.msk.bf16.mxu1 %vm2650_vm2, %v2649_v9  ;;  %s3431_s5 = sld [smem:[#allocation33_spill]]  ;;  %s2651_s4 = smov 104   ;;  %vm1197_vm7 = vcmask 1043456   ;;  %vm1737_vm10 = vcmask 523264  }
  0xb3   : > { %809 = vadd.xlane.f32.xlu0 %v808_v2  ;;  %2170 = vmatpush3.bf16.msra.mxu1 %v2388_v8  ;;  %v2092_v19 = vld [vmem:[%s3429_s15] ss:$0 sm:$0xff]  ;;  %s2652_s16 = smov 120   ;;  %s2653_s30 = smov 112  }
  0xb4   : > { %2183 = vmatprep.subr.bf16.mxu0 %v2649_v9  ;;  %2171 = vmatprep.subr.bf16.mxu1 %v2649_v9  ;;  %v2093_v22 = vld [vmem:[%s3430_s21] ss:$0 sm:$0xff]  ;;  %s2654_s29 = smov 96   ;;  %s3433_s6 = scalar_lea.vmem [#allocation6], %s3001_s19 }
  0xb5   : > { %2185 = vmatprep.mubr.msk.bf16.mxu0 %vm2650_vm2, %v2649_v9  ;;  %v804_v55 = vld [vmem:[%s3433_s6] sm:$0xff]  ;;  %s2655_s26 = smov 64   ;;  %s3434_s1 = sld [smem:[#allocation35_spill]] }
  0xb6   : > { %vm1137_vm6 = vcmp.eq.f32.partialorder %v804_v55, 0.0  ;;  %p2123_p11 = scmp.ne.s32.totalorder %s2628_s27, 1 }
  0xb7   : > { %2172 = vmatpush3.bf16.msra.mxu1 %v2389_v10  ;;  %s3440_s8 = sld [smem:[#allocation43_spill]] (!%p2123_p11) }
  0xb8   : > { %2177 = vmatprep.subr.bf16.mxu1 %v2649_v9  ;;  %s3432_s11 = scalar_lea.vmem %s3431_s5, %s3024_s17 }
  0xb9   : > { %v2094_v26 = vld [vmem:[%s3432_s11] ss:$0 sm:$0xff] }
  0xbb   : > { %s3435_s0 = scalar_lea.vmem %s3434_s1, %s3024_s17 }
 0x140   : > { %v810_v3 = vpop.xlane.xlu0 %809 }
 0x141   : > { %v812_v4 = vmul.f32 0.03125, %v810_v3 }
 0x143   : > { %v813_v5 = vsub.f32 %v3078_v1, %v812_v4 }
 0x145   : > { %v814_v6 = vmul.f32 %v813_v5, %v813_v5  ;;  %v835_v20 = vmul.f32 %v2092_v19, %v813_v5 }
 0x147   : > { %v815_v7 = vsel %vm807_vm1, %v814_v6, 0.0 }
 0x148   : > { %816 = vadd.xlane.f32.xlu0 %v815_v7 }
 0x1d5   : > { %v817_v11 = vpop.xlane.xlu0 %816 }
 0x1d6   : > { %v819_v12 = vmul.f32 0.032258064, %v817_v11 }
 0x1d8   : > { %2396 = vrsqrt.f32 %v819_v12  ;;  %vm822_vm3 = vcmp.eq.f32.partialorder %v819_v12, inf  ;;  %v825_v15 = vand.u32 2147483648, %v819_v12  ;;  %vm824_vm4 = vcmp.eq.f32.partialorder %v819_v12, 0.0 }
 0x1e2   : > { %v2397_v13 = vpop.eup %2396 }
 0x1e3   : > { %v821_v14 = vmul.f32 %v2397_v13, %v819_v12 }
 0x1e5   : > { %v823_v16 = vsel %vm822_vm3, %v819_v12, %v821_v14 }
 0x1e6   : > { %v826_v17 = vsel %vm824_vm4, %v825_v15, %v823_v16 }
 0x1e7   : > { %v827_v18 = vadd.f32 1e-06, %v826_v17 }
 0x1e9   : > { %2398 = vrcp.f32 %v827_v18 }
 0x1f3   : > { %v2399_v21 = vpop.eup %2398 }
 0x1f4   : > { %v836_v23 = vmul.f32 %v2399_v21, %v835_v20 }
 0x1f6   : > { %v843_v24 = vadd.f32 %v2093_v22, %v836_v23 }
 0x1f8   : > { %v844_v25 = vpack.c.bf16 %v843_v24, %v843_v24 }
 0x1fa   : > { %2174 = vmatmul.mubr.msk.bf16.vlgmr.msra.gmra.mrb[0].mxu1 %vm807_vm1, %v844_v25 }
 0x1fb   : > { %2179 = vmatprep.mubr.msk.bf16.mxu1 %vm2650_vm2, %v2649_v9 }
 0x2cd   : > { %v905_v27 = vpop.f32.mrb[0].mxu1 }
 0x2ce   : > { %v906_v28 = vadd.f32 %v2094_v26, %v905_v27  ;;  %v2175_v29 = vpop.f32.mrb[1].mxu1 }
 0x2cf   : > { %v908_v30 = vpop.f32.mrb[2].mxu1 }
 0x2d0   : > { %933 = vrot.lane.b32.xlu0 %v906_v28, %s2651_s4  ;;  %927 = vrot.lane.b32.xlu1 %v906_v28, %s2652_s16  ;;  %v2176_v31 = vpop.f32.mrb[3].mxu1  ;;  %v911_v32 = vmul.f32 0.35355338, %v906_v28  ;;  %v3112_v33 = vpack.c.bf16 %v906_v28, %v906_v28 }
 0x2d2   : > { %v922_v42 = vpack.c.bf16 %v911_v32, %v911_v32 }
 0x2d4   : > { %930 = vrot.lane.b32.xlu1 %v906_v28, %s2653_s30  ;;  %919 = vrot.lane.b32.xlu0 %v911_v32, %s2651_s4 }
 0x2d8   : > { %941 = vrot.lane.b32.xlu1 %v3112_v33, %s2654_s29 }
 0x2dc   : > { %913 = vrot.lane.b32.xlu1 %v911_v32, %s2652_s16 }
 0x342   : > { %v928_v34 = vpop.permute.xlu1 %927  ;;  %v934_v38 = vpop.permute.xlu0 %933 }
 0x343   : > { %v3115_v35 = vpack.c.bf16 %v928_v34, %v928_v34  ;;  %v3121_v40 = vpack.c.bf16 %v934_v38, %v934_v38 }
 0x345   : > { %991 = vrot.lane.b32.xlu1 %v3115_v35, %s2654_s29 }
 0x346   : > { %v931_v36 = vpop.permute.xlu1 %930  ;;  %v920_v51 = vpop.permute.xlu0 %919 }
 0x347   : > { %v3118_v37 = vpack.c.bf16 %v931_v36, %v931_v36  ;;  %v925_v54 = vpack.c.bf16 %v920_v51, %v920_v51 }
 0x349   : > { %1040 = vrot.lane.b32.xlu1 %v3118_v37, %s2654_s29 }
 0x34a   : > { %v942_v39 = vpop.permute.xlu1 %941 }
 0x34b   : > { %v948_v41 = vsel %vm943_vm5, %v942_v39, 0 }
 0x34c   : > { %2178 = vmatpush3.bf16.xpose.msra.mxu1 %v948_v41 }
 0x34d   : > { %1089 = vrot.lane.b32.xlu1 %v3121_v40, %s2654_s29  ;;  %2189 = vmatprep.subr.bf16.mxu1 %v2649_v9 }
 0x34e   : > { %v914_v43 = vpop.permute.xlu1 %913 }
 0x34f   : > { %v923_v48 = vpack.c.bf16 %v914_v43, %v914_v43 }
 0x351   : > { %916 = vrot.lane.b32.xlu1 %v911_v32, %s2653_s30 }
 0x353   : > { %2180 = vmatmul.mubr.msk.bf16.vlgmr.msra.gmra.mrb[4].mxu1 %vm943_vm5, %v922_v42 }
 0x354   : > { %2191 = vmatprep.mubr.msk.bf16.mxu1 %vm2650_vm2, %v2649_v9 }
 0x3b7   : > { %v992_v44 = vpop.permute.xlu1 %991 }
 0x3b8   : > { %v997_v45 = vsel %vm943_vm5, %v992_v44, 0 }
 0x3b9   : > { %2184 = vmatpush3.bf16.xpose.msra.mxu0 %v997_v45 }
 0x3ba   : > { %2195 = vmatprep.subr.bf16.mxu0 %v2649_v9 }
 0x3bb   : > { %v1041_v46 = vpop.permute.xlu1 %1040 }
 0x3bc   : > { %v1046_v47 = vsel %vm943_vm5, %v1041_v46, 0 }
 0x3bd   : > { %2190 = vmatpush3.bf16.xpose.msra.mxu1 %v1046_v47 }
 0x3be   : > { %2201 = vmatprep.subr.bf16.mxu1 %v2649_v9 }
 0x3bf   : > { %v1090_v49 = vpop.permute.xlu1 %1089 }
 0x3c0   : > { %v1095_v50 = vsel %vm943_vm5, %v1090_v49, 0  ;;  %2186 = vmatmul.mubr.msk.bf16.vlgmr.msra.gmra.mrb[0].mxu0 %vm943_vm5, %v923_v48 }
 0x3c1   : > { %2196 = vmatpush3.bf16.xpose.msra.mxu0 %v1095_v50  ;;  %2197 = vmatprep.mubr.msk.bf16.mxu0 %vm2650_vm2, %v2649_v9 }
 0x3c2   : > { %2207 = vmatprep.subr.bf16.mxu0 %v2649_v9 }
 0x3c3   : > { %v917_v52 = vpop.permute.xlu1 %916 }
 0x3c4   : > { %v924_v53 = vpack.c.bf16 %v917_v52, %v917_v52 }
 0x3c6   : > { %2192 = vmatmul.mubr.msk.bf16.vlgmr.msra.gmra.mrb[8].mxu1 %vm943_vm5, %v924_v53 }
 0x3c7   : > { %2203 = vmatprep.mubr.msk.bf16.mxu1 %vm2650_vm2, %v2649_v9 }
 0x3c8   : > { %2198 = vmatmul.mubr.msk.bf16.vlgmr.msra.gmra.mrb[4].mxu0 %vm943_vm5, %v925_v54 }
 0x3c9   : > { %2209 = vmatprep.mubr.msk.bf16.mxu0 %vm2650_vm2, %v2649_v9 }
 0x426   : > { %v984_v56 = vpop.f32.mrb[4].mxu1 }
 0x427   : > { %v1140_v57 = vsel %vm1137_vm6, -1e+09, %v984_v56  ;;  %v2181_v58 = vpop.f32.mrb[5].mxu1 }
 0x428   : > { %v987_v59 = vpop.f32.mrb[6].mxu1  ;;  %v1144_v60 = vsel %vm943_vm5, %v1140_v57, -inf }
 0x429   : > { %1145 = vmax.xlane.f32.xlu1 %v1144_v60  ;;  %v2182_v61 = vpop.f32.mrb[7].mxu1  ;;  %v1390_v60 = vld [vmem:[%s3047_s18 + $0x4] sm:$0xf] }
 0x493   : > { %v1033_v62 = vpop.f32.mrb[0].mxu0 }
 0x494   : > { %v1141_v63 = vsel %vm1137_vm6, -1e+09, %v1033_v62  ;;  %v2187_v0 = vpop.f32.mrb[1].mxu0 }
 0x495   : > { %v1036_v2 = vpop.f32.mrb[2].mxu0  ;;  %v1147_v3 = vsel %vm943_vm5, %v1141_v63, -inf }
 0x496   : > { %1148 = vmax.xlane.f32.xlu0 %v1147_v3  ;;  %v2188_v4 = vpop.f32.mrb[3].mxu0  ;;  %v1443_v2 = vsel %vm1197_vm7, %v1390_v60, 0  ;;  %v1391_v3 = vld [vmem:[%s3047_s18 + $0x8] sm:$0xf]  ;;  %v2390_v60 = vld [vmem:[%s3064_s22] sm:$0xff]  }
 0x499   : > { %v1082_v5 = vpop.f32.mrb[8].mxu1 }
 0x49a   : > { %v1142_v6 = vsel %vm1137_vm6, -1e+09, %v1082_v5  ;;  %v2193_v7 = vpop.f32.mrb[9].mxu1 }
 0x49b   : > { %v1085_v8 = vpop.f32.mrb[10].mxu1  ;;  %v1131_v10 = vpop.f32.mrb[4].mxu0  ;;  %v1150_v11 = vsel %vm943_vm5, %v1142_v6, -inf  ;;  %v1489_v7 = vsel %vm1197_vm7, %v1391_v3, 0 }
 0x49c   : > { %v1143_v12 = vsel %vm1137_vm6, -1e+09, %v1131_v10  ;;  %v2199_v13 = vpop.f32.mrb[5].mxu0  ;;  %1151 = vmax.xlane.f32.xlu0 %v1150_v11  ;;  %v2194_v14 = vpop.f32.mrb[11].mxu1  ;;  %v1392_v11 = vld [vmem:[%s3047_s18 + $0xc] sm:$0xf] }
 0x49d   : > { %v1134_v15 = vpop.f32.mrb[6].mxu0  ;;  %v1153_v16 = vsel %vm943_vm5, %v1143_v12, -inf }
 0x49e   : > { %v2200_v17 = vpop.f32.mrb[7].mxu0  ;;  %1154 = vmax.xlane.f32.xlu1 %v1153_v16  ;;  %v1535_v15 = vsel %vm1197_vm7, %v1392_v11, 0 }
 0x4af   : > { %1241 = vrot.lane.b32.xlu1 %v3115_v35, %s2655_s26 }
 0x4b2   : > { %1192 = vrot.lane.b32.xlu0 %v3112_v33, %s2655_s26 }
 0x4b6   : > { %v1146_v18 = vpop.xlane.xlu1 %1145 }
 0x4b7   : > { %v1156_v19 = vsub.f32 %v1140_v57, %v1146_v18  ;;  %v1389_v57 = vld [vmem:[%s3047_s18] sm:$0xf] }
 0x4b9   : > { %v1160_v20 = vmul.f32 1.442695, %v1156_v19 }
 0x4bb   : > { %2400 = vpow2.f32 %v1160_v20 }
 0x4c5   : > { %v2401_v21 = vpop.eup %2400 }
 0x4c6   : > { %v1168_v22 = vsel %vm943_vm5, %v2401_v21, 0.0 }
 0x4d1   : > { %1169 = vadd.xlane.f32.xlu0 %v1168_v22 }
 0x523   : > { %v1149_v23 = vpop.xlane.xlu0 %1148 }
 0x524   : > { %v1157_v24 = vsub.f32 %v1141_v63, %v1149_v23  ;;  %v1397_v63 = vsel %vm1197_vm7, %v1389_v57, 0 }
 0x526   : > { %v1162_v25 = vmul.f32 1.442695, %v1157_v24 }
 0x528   : > { %2402 = vpow2.f32 %v1162_v25 }
 0x529   : > { %v1152_v26 = vpop.xlane.xlu0 %1151 }
 0x52a   : > { %v1158_v27 = vsub.f32 %v1142_v6, %v1152_v26 }
 0x52b   : > { %v1155_v28 = vpop.xlane.xlu1 %1154 }
 0x52c   : > { %v1164_v29 = vmul.f32 1.442695, %v1158_v27  ;;  %v1159_v30 = vsub.f32 %v1143_v12, %v1155_v28 }
 0x52d   : > { %v1193_v31 = vpop.permute.xlu0 %1192 }
 0x52e   : > { %2404 = vpow2.f32 %v1164_v29  ;;  %v1166_v32 = vmul.f32 1.442695, %v1159_v30  ;;  %v1199_v33 = vsel %vm1197_vm7, %v1193_v31, 0 }
 0x52f   : > { %v1242_v34 = vpop.permute.xlu1 %1241  ;;  %2202 = vmatpush3.bf16.msra.mxu1 %v1199_v33 }
 0x530   : > { %2406 = vpow2.f32 %v1166_v32  ;;  %v1247_v35 = vsel %vm1197_vm7, %v1242_v34, 0  ;;  %2213 = vmatprep.subr.bf16.mxu1 %v2649_v9 }
 0x531   : > { %2208 = vmatpush3.bf16.msra.mxu0 %v1247_v35 }
 0x532   : > { %v2403_v36 = vpop.eup %2402  ;;  %2219 = vmatprep.subr.bf16.mxu0 %v2649_v9 }
 0x533   : > { %v1171_v38 = vsel %vm943_vm5, %v2403_v36, 0.0 }
 0x534   : > { %1172 = vadd.xlane.f32.xlu1 %v1171_v38 }
 0x538   : > { %v2405_v39 = vpop.eup %2404 }
 0x539   : > { %v1174_v41 = vsel %vm943_vm5, %v2405_v39, 0.0 }
 0x53a   : > { %v2407_v42 = vpop.eup %2406  ;;  %1175 = vadd.xlane.f32.xlu0 %v1174_v41 }
 0x53b   : > { %v1177_v43 = vsel %vm943_vm5, %v2407_v42, 0.0 }
 0x53c   : > { %1178 = vadd.xlane.f32.xlu1 %v1177_v43 }
 0x54d   : > { %1289 = vrot.lane.b32.xlu1 %v3118_v37, %s2655_s26 }
 0x550   : > { %1337 = vrot.lane.b32.xlu0 %v3121_v40, %s2655_s26 }
 0x55e   : > { %v1170_v44 = vpop.xlane.xlu0 %1169 }
 0x55f   : > { %2408 = vrcp.f32 %v1170_v44 }
 0x569   : > { %v2409_v45 = vpop.eup %2408 }
 0x56a   : > { %v1184_v46 = vmul.f32 %v2409_v45, %v2401_v21 }
 0x56c   : > { %v1188_v47 = vpack.c.bf16 %v1184_v46, %v1184_v46 }
 0x56e   : > { %2204 = vmatmul.mubr.msk.bf16.vlgmr.msra.gmra.mrb[12].mxu1 %vm943_vm5, %v1188_v47 }
 0x56f   : > { %2215 = vmatprep.mubr.msk.bf16.mxu1 %vm2650_vm2, %v2649_v9 }
 0x5c1   : > { %v1173_v48 = vpop.xlane.xlu1 %1172 }
 0x5c2   : > { %2410 = vrcp.f32 %v1173_v48  ;;  %v2110_v48 = vld [vmem:[%s3435_s0] ss:$0 sm:$0xff] }
 0x5c7   : > { %v1176_v49 = vpop.xlane.xlu0 %1175 }
 0x5c8   : > { %2412 = vrcp.f32 %v1176_v49 }
 0x5c9   : > { %v1179_v50 = vpop.xlane.xlu1 %1178 }
 0x5ca   : > { %2414 = vrcp.f32 %v1179_v50 }
 0x5cb   : > { %v1338_v52 = vpop.permute.xlu0 %1337 }
 0x5cc   : > { %v2411_v37 = vpop.eup %2410  ;;  %v1343_v55 = vsel %vm1197_vm7, %v1338_v52, 0 }
 0x5cd   : > { %v1185_v51 = vmul.f32 %v2411_v37, %v2403_v36  ;;  %v1290_v40 = vpop.permute.xlu1 %1289 }
 0x5ce   : > { %v1295_v53 = vsel %vm1197_vm7, %v1290_v40, 0 }
 0x5cf   : > { %2214 = vmatpush3.bf16.msra.mxu1 %v1295_v53  ;;  %v1189_v54 = vpack.c.bf16 %v1185_v51, %v1185_v51 }
 0x5d0   : > { %2225 = vmatprep.subr.bf16.mxu1 %v2649_v9 }
 0x5d1   : > { %2210 = vmatmul.mubr.msk.bf16.vlgmr.msra.gmra.mrb[8].mxu0 %vm943_vm5, %v1189_v54 }
 0x5d2   : > { %v2413_v56 = vpop.eup %2412  ;;  %2220 = vmatpush3.bf16.msra.mxu0 %v1343_v55  ;;  %2221 = vmatprep.mubr.msk.bf16.mxu0 %vm2650_vm2, %v2649_v9 }
 0x5d3   : > { %v1186_v58 = vmul.f32 %v2413_v56, %v2405_v39  ;;  %2231 = vmatprep.subr.bf16.mxu0 %v2649_v9 }
 0x5d4   : > { %v2415_v59 = vpop.eup %2414 }
 0x5d5   : > { %v1187_v61 = vmul.f32 %v2415_v59, %v2407_v42  ;;  %v1190_v62 = vpack.c.bf16 %v1186_v58, %v1186_v58 }
 0x5d7   : > { %2216 = vmatmul.mubr.msk.bf16.vlgmr.msra.gmra.mrb[16].mxu1 %vm943_vm5, %v1190_v62  ;;  %v1191_v0 = vpack.c.bf16 %v1187_v61, %v1187_v61  ;;  %v2391_v61 = vld [vmem:[%s3064_s22 + $0x8] sm:$0xff]   ;;  %v2392_v62 = vld [vmem:[%s3074_s13] sm:$0xff]  }
 0x5d8   : > { %2226 = vmatpush3.bf16.msra.mxu1 %v1397_v63  ;;  %2227 = vmatprep.mubr.msk.bf16.mxu1 %vm2650_vm2, %v2649_v9 }
 0x5d9   : > { %2222 = vmatmul.mubr.msk.bf16.vlgmr.msra.gmra.mrb[12].mxu0 %vm943_vm5, %v1191_v0  ;;  %2237 = vmatprep.subr.bf16.mxu1 %v2649_v9 }
 0x5da   : > { %2232 = vmatpush3.bf16.msra.mxu0 %v1443_v2  ;;  %2233 = vmatprep.mubr.msk.bf16.mxu0 %vm2650_vm2, %v2649_v9 }
 0x5db   : > { %2243 = vmatprep.subr.bf16.mxu0 %v2649_v9 }
 0x641   : > { %v1235_v4 = vpop.f32.mrb[12].mxu1 }
 0x642   : > { %v1385_v5 = vpack.c.bf16 %v1235_v4, %v1235_v4  ;;  %v2205_v6 = vpop.f32.mrb[13].mxu1 }
 0x643   : > { %v1238_v8 = vpop.f32.mrb[14].mxu1 }
 0x644   : > { %v2206_v10 = vpop.f32.mrb[15].mxu1  ;;  %2228 = vmatmul.mubr.msk.bf16.vlgmr.msra.gmra.mrb[20].mxu1 %vm943_vm5, %v1385_v5  ;;  %v2111_v8 = vld [vmem:[%s778_s23] ss:$0 sm:$0xff] }
 0x645   : > { %2238 = vmatpush3.bf16.msra.mxu1 %v1489_v7  ;;  %2239 = vmatprep.mubr.msk.bf16.mxu1 %vm2650_vm2, %v2649_v9 }
 0x646   : > { %2249 = vmatprep.subr.bf16.mxu1 %v2649_v9 }
 0x6a4   : > { %v1283_v12 = vpop.f32.mrb[8].mxu0 }
 0x6a5   : > { %v1386_v13 = vpack.c.bf16 %v1283_v12, %v1283_v12  ;;  %v2211_v14 = vpop.f32.mrb[9].mxu0  ;;  %v2112_v12 = vld [vmem:[%s781_s24] ss:$0 sm:$0xff] }
 0x6a6   : > { %v1286_v16 = vpop.f32.mrb[10].mxu0 }
 0x6a7   : > { %v2212_v17 = vpop.f32.mrb[11].mxu0  ;;  %2234 = vmatmul.mubr.msk.bf16.vlgmr.msra.gmra.mrb[16].mxu0 %vm943_vm5, %v1386_v13  ;;  %v2394_v16 = vld [vmem:[%s3074_s13 + $0x10] sm:$0xff]  }
 0x6a8   : > { %2244 = vmatpush3.bf16.msra.mxu0 %v1535_v15  ;;  %2245 = vmatprep.mubr.msk.bf16.mxu0 %vm2650_vm2, %v2649_v9  ;;  %v2395_v17 = vld [vmem:[%s3074_s13 + $0x18] sm:$0xff]  }
 0x6a9   : > { %2257 = vmatprep.subr.bf16.mxu0 %v2649_v9 }
 0x6aa   : > { %v1331_v18 = vpop.f32.mrb[16].mxu1 }
 0x6ab   : > { %v1387_v19 = vpack.c.bf16 %v1331_v18, %v1331_v18  ;;  %v2217_v20 = vpop.f32.mrb[17].mxu1  ;;  %v2113_v18 = vld [vmem:[%s3016_s14] ss:$0 sm:$0xff]  ;;  %s3439_s14 = sld [smem:[#allocation42_spill]] (!%p2123_p11) }
 0x6ac   : > { %v1334_v21 = vpop.f32.mrb[18].mxu1  ;;  %v1379_v22 = vpop.f32.mrb[12].mxu0 }
 0x6ad   : > { %v1388_v23 = vpack.c.bf16 %v1379_v22, %v1379_v22  ;;  %v2218_v24 = vpop.f32.mrb[19].mxu1  ;;  %v2223_v25 = vpop.f32.mrb[13].mxu0  ;;  %2240 = vmatmul.mubr.msk.bf16.vlgmr.msra.gmra.mrb[24].mxu1 %vm943_vm5, %v1387_v19 }
 0x6ae   : > { %v1382_v26 = vpop.f32.mrb[14].mxu0  ;;  %2253 = vmatprep.mubr.msk.bf16.mxu1 %vm2650_vm2, %v2649_v9  ;;  %2250 = vmatpush3.bf16.msra.mxu1 %v2390_v60 }
 0x6af   : > { %v2224_v27 = vpop.f32.mrb[15].mxu0  ;;  %2246 = vmatmul.mubr.msk.bf16.vlgmr.msra.gmra.mrb[20].mxu0 %vm943_vm5, %v1388_v23  ;;  %2251 = vmatprep.subr.bf16.mxu1 %v2649_v9  ;;  %v2117_v26 = vld [vmem:[%s794_s20] ss:$0 sm:$0xff] }
 0x6b0   : > { %2265 = vmatprep.mubr.msk.bf16.mxu0 %vm2650_vm2, %v2649_v9  ;;  %2258 = vmatpush3.bf16.msra.mxu0 %v2392_v62 }
 0x6b1   : > { %2259 = vmatprep.subr.bf16.mxu0 %v2649_v9 }
 0x6b2   : > { %2252 = vmatpush3.bf16.msra.mxu1 %v2391_v61 }
 0x717   : > { %v1433_v28 = vpop.f32.mrb[20].mxu1 }
 0x718   : > { %v2229_v29 = vpop.f32.mrb[21].mxu1  ;;  %v1577_v33 = vsel %vm807_vm1, %v1433_v28, 0.0 }
 0x719   : > { %v1436_v30 = vpop.f32.mrb[22].mxu1 }
 0x71a   : > { %v2230_v31 = vpop.f32.mrb[23].mxu1 }
 0x77a   : > { %v1479_v32 = vpop.f32.mrb[16].mxu0 }
 0x77b   : > { %v1578_v34 = vsel %vm807_vm1, %v1479_v32, 0.0  ;;  %v2235_v35 = vpop.f32.mrb[17].mxu0 }
 0x77c   : > { %v1579_v36 = vadd.f32 %v1578_v34, %v1577_v33  ;;  %v1482_v38 = vpop.f32.mrb[18].mxu0 }
 0x77d   : > { %v2236_v39 = vpop.f32.mrb[19].mxu0 }
 0x780   : > { %v1525_v41 = vpop.f32.mrb[24].mxu1 }
 0x781   : > { %v1580_v42 = vsel %vm807_vm1, %v1525_v41, 0.0  ;;  %v2241_v43 = vpop.f32.mrb[25].mxu1 }
 0x782   : > { %v1581_v44 = vadd.f32 %v1580_v42, %v1579_v36  ;;  %v1528_v45 = vpop.f32.mrb[26].mxu1  ;;  %v1571_v46 = vpop.f32.mrb[20].mxu0 }
 0x783   : > { %v1582_v47 = vsel %vm807_vm1, %v1571_v46, 0.0  ;;  %v2242_v49 = vpop.f32.mrb[27].mxu1  ;;  %v2247_v50 = vpop.f32.mrb[21].mxu0 }
 0x784   : > { %v1583_v37 = vadd.f32 %v1582_v47, %v1581_v44  ;;  %v1574_v51 = vpop.f32.mrb[22].mxu0 }
 0x785   : > { %v2248_v40 = vpop.f32.mrb[23].mxu0 }
 0x786   : > { %v1591_v52 = vadd.f32 %v2110_v48, %v1583_v37  ;;  %v2124_v48 = vld [vmem:[%s3439_s14] ss:$0 sm:$0xff] (!%p2123_p11) }
 0x787   : > { %v2125_v37 = vld [vmem:[%s3440_s8] ss:$0 sm:$0xff] (!%p2123_p11) }
 0x788   : > { %v1592_v53 = vadd.f32 %v1591_v52, %v3078_v1  ;;  %v2393_v1 = vld [vmem:[%s3074_s13 + $0x8] sm:$0xff]  }
 0x789   : > { %2260 = vmatpush3.bf16.msra.mxu0 %v2393_v1 }
 0x78a   : > { %v1595_v54 = vsel %vm807_vm1, %v1592_v53, 0.0  ;;  %2261 = vmatprep.subr.bf16.mxu0 %v2649_v9 }
 0x78b   : > { %1596 = vadd.xlane.f32.xlu1 %v1595_v54 }
 0x78d   : > { %2262 = vmatpush3.bf16.msra.mxu0 %v2394_v16 }
 0x78e   : > { %2263 = vmatprep.subr.bf16.mxu0 %v2649_v9 }
 0x791   : > { %2264 = vmatpush3.bf16.msra.mxu0 %v2395_v17 }
 0x818   : > { %v1597_v55 = vpop.xlane.xlu1 %1596 }
 0x819   : > { %v1598_v56 = vmul.f32 0.03125, %v1597_v55 }
 0x81b   : > { %v1599_v57 = vsub.f32 %v1592_v53, %v1598_v56 }
 0x81d   : > { %v1600_v58 = vmul.f32 %v1599_v57, %v1599_v57  ;;  %v1620_v10 = vmul.f32 %v2111_v8, %v1599_v57 }
 0x81f   : > { %v1601_v59 = vsel %vm807_vm1, %v1600_v58, 0.0 }
 0x820   : > { %1602 = vadd.xlane.f32.xlu0 %v1601_v59 }
 0x8ad   : > { %v1603_v63 = vpop.xlane.xlu0 %1602 }
 0x8ae   : > { %v1604_v0 = vmul.f32 0.032258064, %v1603_v63 }
 0x8b0   : > { %2416 = vrsqrt.f32 %v1604_v0  ;;  %vm1607_vm8 = vcmp.eq.f32.partialorder %v1604_v0, inf  ;;  %v1610_v4 = vand.u32 2147483648, %v1604_v0  ;;  %vm1609_vm9 = vcmp.eq.f32.partialorder %v1604_v0, 0.0 }
 0x8ba   : > { %v2417_v2 = vpop.eup %2416 }
 0x8bb   : > { %v1606_v3 = vmul.f32 %v2417_v2, %v1604_v0 }
 0x8bd   : > { %v1608_v5 = vsel %vm1607_vm8, %v1604_v0, %v1606_v3 }
 0x8be   : > { %v1611_v6 = vsel %vm1609_vm9, %v1610_v4, %v1608_v5 }
 0x8bf   : > { %v1612_v7 = vadd.f32 1e-06, %v1611_v6 }
 0x8c1   : > { %2418 = vrcp.f32 %v1612_v7 }
 0x8cb   : > { %v2419_v11 = vpop.eup %2418 }
 0x8cc   : > { %v1621_v13 = vmul.f32 %v2419_v11, %v1620_v10 }
 0x8ce   : > { %v1628_v14 = vadd.f32 %v2112_v12, %v1621_v13 }
 0x8d0   : > { %v1629_v15 = vpack.c.bf16 %v1628_v14, %v1628_v14 }
 0x8d2   : > { %2254 = vmatmul.mubr.msk.bf16.vlgmr.msra.gmra.mrb[28].mxu1 %vm807_vm1, %v1629_v15 }
 0x9a5   : > { %v1690_v19 = vpop.f32.mrb[28].mxu1 }
 0x9a6   : > { %v1691_v20 = vadd.f32 %v2113_v18, %v1690_v19  ;;  %v2255_v21 = vpop.f32.mrb[29].mxu1 }
 0x9a7   : > { %v1693_v22 = vpop.f32.mrb[30].mxu1 }
 0x9a8   : > { %v1696_v23 = vmax.f32 %v1691_v20, 0.0  ;;  %v2256_v24 = vpop.f32.mrb[31].mxu1 }
 0x9aa   : > { %v1697_v25 = vpack.c.bf16 %v1696_v23, %v1696_v23 }
 0x9ac   : > { %2266 = vmatmul.mubr.msk.bf16.vlgmr.msra.gmra.mrb[24].mxu0 %vm1737_vm10, %v1697_v25 }
 0xa7e   : > { %1786 = sbr.rel (%p2123_p11) target bundleno = 3019 (0xbcb), region = 104 }
 0xa7f   : > { %v1775_v27 = vpop.f32.mrb[24].mxu0 }
 0xa80   : > { %v1776_v28 = vadd.f32 %v2117_v26, %v1775_v27  ;;  %v2267_v9 = vpop.f32.mrb[25].mxu0 }
 0xa81   : > { %v1778_v29 = vpop.f32.mrb[26].mxu0 }
 0xa82   : > { %v1781_v30 = vadd.f32 %v1776_v28, %v1592_v53  ;;  %v2268_v31 = vpop.f32.mrb[27].mxu0 }
 0xa84   : > { %1782 = vst.msk [vmem:[#allocation2] sm:$0xff] %vm807_vm1, %v1781_v30  ;;  %v1789_v32 = vsel (!%p2123_p11), %vm807_vm1, %v1781_v30, 0.0 }
 0xa85   : > { %1790 = vadd.xlane.f32.xlu0 %v1789_v32 }
 0xb12   : > { %v1791_v33 = vpop.xlane.xlu0 %1790 }
 0xb13   : > { %v1792_v34 = vmul.f32 0.03125, %v1791_v33 }
 0xb15   : > { %v1793_v35 = vsub.f32 %v1781_v30, %v1792_v34 }
 0xb17   : > { %v1794_v36 = vmul.f32 %v1793_v35, %v1793_v35  ;;  %v1814_v49 = vmul.f32 %v2124_v48, %v1793_v35 }
 0xb19   : > { %v1795_v38 = vsel %vm807_vm1, %v1794_v36, 0.0 }
 0xb1a   : > { %1796 = vadd.xlane.f32.xlu0 %v1795_v38 }
 0xba7   : > { %v1797_v39 = vpop.xlane.xlu0 %1796 }
 0xba8   : > { %v1798_v41 = vmul.f32 0.032258064, %v1797_v39 }
 0xbaa   : > { %2420 = vrsqrt.f32 %v1798_v41  ;;  %vm1801_vm11 = vcmp.eq.f32.partialorder %v1798_v41, inf  ;;  %v1804_v44 = vand.u32 2147483648, %v1798_v41  ;;  %vm1803_vm12 = vcmp.eq.f32.partialorder %v1798_v41, 0.0 }
 0xbb4   : > { %v2421_v42 = vpop.eup %2420 }
 0xbb5   : > { %v1800_v43 = vmul.f32 %v2421_v42, %v1798_v41 }
 0xbb7   : > { %v1802_v45 = vsel %vm1801_vm11, %v1798_v41, %v1800_v43 }
 0xbb8   : > { %v1805_v46 = vsel %vm1803_vm12, %v1804_v44, %v1802_v45 }
 0xbb9   : > { %v1806_v47 = vadd.f32 1e-06, %v1805_v46 }
 0xbbb   : > { %2422 = vrcp.f32 %v1806_v47 }
 0xbc5   : > { %v2423_v50 = vpop.eup %2422 }
 0xbc6   : > { %v1815_v51 = vmul.f32 %v2423_v50, %v1814_v49 }
 0xbc8   : > { %v1822_v40 = vadd.f32 %v2125_v37, %v1815_v51 }
 0xbca   : > { %1823 = vst.msk [vmem:[%s753_s12] sm:$0xff] %vm807_vm1, %v1822_v40 }
 0xbcb PF: > { %s3441_s5 = sld [smem:[#allocation19_spill]]  ;;  %s3442_s11 = sld [smem:[#allocation29_spill]] }
 0xbcc   : > { %s3443_s4 = sld [smem:[#allocation23_spill]]  ;;  %s3444_s6 = sld [smem:[#allocation44_spill]] }
 0xbcd   : > { %s1838_s18 = sshll.u32 %s753_s12, 4  ;;  %s2656_s0 = smov [#allocation9]   ;;  %s1839_s18 = int_to_ptr.vmem [resolvable:$true] %s1838_s18 }
 0xbce   : > { %s2514_s1 = scalar_lea.vmem %s1839_s18, 128  ;;  %s2518_s22 = sshll.u32 %s2656_s0, 4  ;;  %s2519_s22 = int_to_ptr.vmem [resolvable:$false] %s2518_s22 }
 0xbcf   : > { %p2515_p7 = scmp.ne.s32.totalorder %s1839_s18, %s2514_s1  ;;  %s2520_s7 = scalar_lea.vmem %s2519_s22, 256 }
 0xbd0   : > { %p2521_p2 = scmp.lt.s32.totalorder %s1839_s18, %s2519_s22  ;;  %p2522_p6 = scmp.lt.s32.totalorder %s2520_s7, %s2514_s1 }
 0xbd1   : > { %s2127_s16 = sshll.u32 %s3441_s5, 7  ;;  %s1825_s25 = scalar_lea.sflag [#allocation5], %s3442_s11 }
 0xbd2   : > { %s3266_s26 = scalar_lea.hbm %s3444_s6, %s2127_s16  ;;  %p3445_p3 = scmp.ne.s32.totalorder %s3443_s4, 0 }
 0xbd3   : > { %p2523_p12 = por %p2522_p6, %p2521_p2 }
 0xbd4   : > { %p2516_p10 = pnand %p2515_p7, %p3445_p3 }
 0xbd6   : > { %p2517_p8 = pneg %p2516_p10 }
 0xbd8   : > { %p2524_p4 = pnand %p2523_p12, %p2517_p8 }
 0xbda   : > { %2527 = shalt.err (!%p2524_p4)
}
 0xbdb   : > { %s2528_s19 = scalar_lea.hbm %s3266_s26, 128  ;;  %s2532_s28 = scalar_lea.hbm %s3444_s6, 256 }
 0xbdc   : > { %p2529_p5 = scmp.ne.s32.totalorder %s3266_s26, %s2528_s19  ;;  %p2533_p9 = scmp.lt.u32.totalorder %s3266_s26, %s3444_s6 }
 0xbdd   : > { %p2534_p1 = scmp.lt.u32.totalorder %s2532_s28, %s2528_s19  ;;  %p2536_p7 = scmp.lt.u32.totalorder %s2528_s19, %s3266_s26 }
 0xbde   : > { %p2530_p0 = pnand %p2529_p5, %p3445_p3 }
 0xbdf   : > { %p2535_p11 = por %p2534_p1, %p2533_p9 }
 0xbe0   : > { %p2531_p13 = pneg %p2530_p0 }
 0xbe1   : > { %p2537_p10 = por %p2536_p7, %p2535_p11 }
 0xbe3   : > { %p2538_p8 = pnand %p2537_p10, %p2531_p13 }
 0xbe5   : > { %2541 = shalt.err (!%p2538_p8)
}
 0xbe6   : > { %2275 = dma.vmem_to_hbm [thread:$0]  (%p3445_p3), %s1839_s18, 128, %s3266_s26, %s1825_s25  }
 0xbe7 PF: > { %s3446_s23 = sld [smem:[#allocation22_spill]]  ;;  %s3447_s24 = sld [smem:[#allocation16_spill]] }
 0xbe8   : > { %s3448_s10 = sld [smem:[#allocation24_spill]] }
 0xbed   : > { %p2292_p2 = scmp.ge.s32.totalorder %s3446_s23, 2  ;;  %s1850_s27 = sand.u32 1, %s3447_s24  }
 0xbee   : > { %p3449_p6 = scmp.ne.s32.totalorder %s3448_s10, 0  ;;  %s1851_s20 = scalar_lea.sflag [#allocation5], %s1850_s27 }
 0xbf0   : > { %p2288_p12 = pnand %p2292_p2, %p3449_p6 }
 0xbf2   : > { %2599 = dma.done.wait (!%p2288_p12), %s1851_s20, 128  }
 0xbf3   : > { %2601 = vsyncadd (!%p2288_p12), %s1851_s20, 4294967168  ;;  %s35_s0 = sadd.s32 1, %s3446_s23   ;;  %s3450_s21 = sld [smem:[#allocation14_spill]] }
 0xbf4   : > { %p32_p4 = scmp.ge.s32.totalorder %s35_s0, 6   ;;  %s3451_s22 = sld [smem:[#allocation15_spill]] }
 0xbf5   : > { %s3452_s23 = sld [smem:[#allocation27_spill]]  ;;  %s3453_s24 = sld [smem:[#allocation17_spill]] }
 0xbf6   : > { %s3454_s25 = sld [smem:[#allocation18_spill]]  ;;  %s3455_s26 = sld [smem:[#allocation28_spill]] }
 0xbf7   : > { %s3456_s27 = sld [smem:[#allocation20_spill]]  ;;  %s3457_s28 = sld [smem:[#allocation21_spill]] }
 0xbf8   : > { %s3458_s29 = sld [smem:[#allocation25_spill]]  ;;  %s3459_s30 = sld [smem:[#allocation26_spill]] }
 0xbf9   :  { %34 = sbr.rel (!%p32_p4) target bundleno = 27 (0x1b), region = 194 }
 0xc00   :  { %1856 = vsyncpa [#allocation4], 1 }
 0xc01   :  { %1858 = vsyncpa [#allocation4 + $0x1], 1 }
 0xc02   :  { %1859 = vsyncpa [#allocation7], 1 }
 0xc03   :  { %1861 = vsyncpa [#allocation7 + $0x1], 1 }
 0xc04   :  { %1862 = vsyncpa [#allocation5], 1 }
 0xc05   :  { %1864 = vsyncpa [#allocation5 + $0x1], 1 }

</bundles_post_ra>
